<compile_context>
chip_gen: v7x
topology: tpu7x:2x2x1
jax: 0.10.0
libtpu: 0.0.40
codegen_flags: <defaults>
</compile_context>

<pallas_src>
import math
import numpy as np

import jax
import jax.numpy as jnp
from jax.experimental import pallas as pl
from jax.experimental.pallas import tpu as pltpu  # noqa: F401  (TPU backend assumed)

# ----------------------------- config -------------------------------------
N_VOCAB = 64
N_DIM = 32
N_HEADS = 4
N_HEAD_DIM = N_DIM // N_HEADS
N_LAYERS = 2
N_CTX_MAX = 16
P_DROPOUT = 0.0  # dropout is the identity (p=0 / eval semantics)

N_BATCH = 2
N_CTX = 8


# ------------------- constants from the torch helpers ---------------------
def generate_sinusoidal_encoding(n_context_max: int, n_dim: int) -> jnp.ndarray:
    n_dim_half = n_dim // 2
    assert n_dim == n_dim_half * 2
    periods = 10000 ** (np.arange(n_dim_half) * 2 / n_dim)
    pos = np.arange(n_context_max)
    p = np.outer(pos, 1.0 / periods)
    p_sin = np.sin(p)
    p_cos = np.cos(p)
    p_interleaved = (
        np.concatenate([p_sin.T, p_cos.T], axis=-1).reshape(n_dim, n_context_max).T
    )
    return jnp.asarray(p_interleaved, dtype=jnp.float32)


def generate_default_mask(n_context_max: int) -> jnp.ndarray:
    m = np.full((n_context_max, n_context_max), -np.inf, dtype=np.float32)
    m = np.triu(m, k=1)
    return jnp.asarray(m, dtype=jnp.float32)


# --------------------------- fused Pallas kernel ---------------------------
def _forward_kernel(tok_ref, emb_ref, pos_ref, mask_ref, hsel_ref, bones_ref,
                    wqkv_ref, wo_ref, w13_ref, w2_ref, wu_ref, bu_ref, o_ref):
    M = tok_ref.shape[0]          # B*S flattened tokens
    V, D = emb_ref.shape

    # Embedding lookup as a one-hot MXU matmul (keeps the gather in-kernel),
    # plus the sinusoidal positional encoding.  Dropout(p=0) is the identity.
    onehot = (jax.lax.broadcasted_iota(jnp.int32, (M, V), 1)
              == tok_ref[...]).astype(jnp.float32)
    x = jnp.dot(onehot, emb_ref[...], preferred_element_type=jnp.float32) + pos_ref[...]

    mask = mask_ref[...]      # (M, H*M)   causal + batch-block mask, tiled per head
    hsel = hsel_ref[...]      # (H*M, D)   1.0 where sublane-block h overlaps head h's dims
    bones = bones_ref[...]    # (H*M, H*M) block-diagonal ones (per-head softmax sums)

    def rms_norm(y):
        # RMSNorm gain is folded into the following projection weights.
        return y * jax.lax.rsqrt(jnp.mean(y * y, axis=-1, keepdims=True) + 1e-8)

    for l in range(N_LAYERS):
        # ---- pre-norm 1 + fused QKV projection (scale folded into Wq) ----
        h = rms_norm(x)
        qkv = jnp.dot(h, wqkv_ref[l], preferred_element_type=jnp.float32)   # (M, 3D)
        q = qkv[:, 0:D]
        k = qkv[:, D:2 * D]
        v = qkv[:, 2 * D:3 * D]

        # ---- head-blocked causal attention (heads laid out along lanes) ----
        kb = jnp.concatenate([k] * N_HEADS, axis=0) * hsel                  # (H*M, D)
        vb = jnp.concatenate([v] * N_HEADS, axis=0) * hsel                  # (H*M, D)
        # scores for ALL heads in one wide matmul: col h*M+t = q_h . k_h[t]
        s = jax.lax.dot_general(q, kb, (((1,), (1,)), ((), ())),
                                preferred_element_type=jnp.float32)         # (M, H*M)
        s = s + mask
        # global row max >= each per-head max -> safe, per-head-softmax invariant
        p = jnp.exp(s - jnp.max(s, axis=-1, keepdims=True))
        denom = jnp.dot(p, bones, preferred_element_type=jnp.float32)       # per-head sums
        p = p * pl.reciprocal(denom, approx=True)
        attn = jnp.dot(p, vb, preferred_element_type=jnp.float32)           # (M, D) heads concat
        x = x + jnp.dot(attn, wo_ref[l], preferred_element_type=jnp.float32)

        # ---- pre-norm 2 + SwiGLU FFN (w1/w3 fused, gain folded in) ----
        h2 = rms_norm(x)
        ab = jnp.dot(h2, w13_ref[l], preferred_element_type=jnp.float32)    # (M, 2D)
        a = ab[:, 0:D]
        b = ab[:, D:2 * D]
        gated = a * pl.reciprocal(1.0 + jnp.exp(-a), approx=True) * b       # silu(a) * b
        x = x + jnp.dot(gated, w2_ref[l], preferred_element_type=jnp.float32)

    # ---- unembedding (+ bias) ----
    o_ref[...] = jnp.dot(x, wu_ref[...], preferred_element_type=jnp.float32) + bu_ref[...]


# -------------------------- parameters ------------------------------------
def init_params(key):
    ks = jax.random.split(key, 3 + N_LAYERS)
    scale = 1.0 / math.sqrt(N_DIM)
    params = {
        "embedding": jax.random.normal(ks[0], (N_VOCAB, N_DIM), jnp.float32),
        # torch Linear weight layout is (out_features, in_features)
        "unembed_w": jax.random.normal(ks[1], (N_VOCAB, N_DIM), jnp.float32) * scale,
        "unembed_b": jax.random.normal(ks[2], (N_VOCAB,), jnp.float32) * 0.01,
        "pos_encoding": generate_sinusoidal_encoding(N_CTX_MAX, N_DIM),
        "mask": generate_default_mask(N_CTX_MAX),
        "blocks": [],
    }
    for i in range(N_LAYERS):
        k = jax.random.split(ks[3 + i], 7)
        wq, wk, wv, wo, w1, w2, w3 = (
            jax.random.normal(k[j], (N_DIM, N_DIM), jnp.float32) * scale
            for j in range(7)
        )
        params["blocks"].append(
            dict(
                wq=wq, wk=wk, wv=wv, wo=wo, w1=w1, w2=w2, w3=w3,
                g1=jnp.ones((N_DIM,), jnp.float32),   # RMSNorm weights init to 1
                g2=jnp.ones((N_DIM,), jnp.float32),
            )
        )
    return params


def prepare_kernel_params(params, n_batch, n_ctx):
    """Pack / pre-transpose / fold all weights and build layout constants ONCE.

    Hoisted out of the jitted forward so no per-call transpose/reshape/scale
    ops are emitted by XLA on every step, and no in-kernel VPU work is spent
    on things that are constant per model.
    """
    B, S, D, H, hd = n_batch, n_ctx, N_DIM, N_HEADS, N_HEAD_DIM
    M = B * S
    attn_scale = 1.0 / math.sqrt(hd)

    # Causal mask cropped to S, expanded to the flattened (B*S) token axis with
    # cross-batch attention disabled, then tiled once per head along lanes.
    causal = np.triu(np.full((S, S), -np.inf, dtype=np.float32), k=1)
    batch_ids = np.repeat(np.arange(B), S)
    same_batch = batch_ids[:, None] == batch_ids[None, :]
    mask_bs = np.where(same_batch, np.tile(causal, (B, B)), -np.inf).astype(np.float32)
    mask = np.tile(mask_bs, (1, H))                                     # (M, H*M)

    # Head selector: sublane-tiled K/V block h keeps only head h's 8 model dims.
    hsel = np.zeros((H * M, D), dtype=np.float32)
    for h in range(H):
        hsel[h * M:(h + 1) * M, h * hd:(h + 1) * hd] = 1.0

    # Block-diagonal ones: per-head softmax denominators via one wide matmul.
    bones = np.kron(np.eye(H, dtype=np.float32), np.ones((M, M), dtype=np.float32))

    pos = jnp.tile(params["pos_encoding"][:S], (B, 1))                  # (M, D)

    blocks = params["blocks"]
    wqkvs, wos, w13s, w2s = [], [], [], []
    for b in blocks:
        g1 = b["g1"].reshape(D, 1)
        g2 = b["g2"].reshape(D, 1)
        # torch Linear computes y = x @ W.T -> pre-transpose / pack lane-dense.
        # Fold the RMSNorm gains into the input rows of the following matmuls
        # and fold the attention scale 1/sqrt(hd) into Wq.
        wq_t = (b["wq"].T * g1) * attn_scale
        wk_t = b["wk"].T * g1
        wv_t = b["wv"].T * g1
        wqkvs.append(jnp.concatenate([wq_t, wk_t, wv_t], axis=1))       # (D, 3D)
        wos.append(b["wo"].T)                                            # (D, D)
        w13s.append(jnp.concatenate([b["w1"].T * g2, b["w3"].T * g2], axis=1))  # (D, 2D)
        w2s.append(b["w2"].T)                                            # (D, D)

    return dict(
        emb=params["embedding"],
        pos=pos,
        mask=jnp.asarray(mask),
        hsel=jnp.asarray(hsel),
        bones=jnp.asarray(bones),
        wqkvs=jnp.stack(wqkvs),                                          # (L,D,3D)
        wos=jnp.stack(wos),                                              # (L,D,D)
        w13s=jnp.stack(w13s),                                            # (L,D,2D)
        w2s=jnp.stack(w2s),                                              # (L,D,D)
        wuT=params["unembed_w"].T,                                       # (D,V)
        bu=params["unembed_b"].reshape(1, N_VOCAB),                      # (1,V)
    )


# --------------------------- forward passes --------------------------------
def transformer_forward(tokens, kp):
    """Whole forward pass in a single pallas_call (no grid, all-VMEM)."""
    B, S = tokens.shape
    tok = tokens.reshape(B * S, 1).astype(jnp.int32)
    logits = pl.pallas_call(
        _forward_kernel,
        out_shape=jax.ShapeDtypeStruct((B * S, N_VOCAB), jnp.float32),
        # No grid / BlockSpecs: a single invocation; every operand is a full
        # VMEM-resident block (total <100 KB on any TPU generation).
    )(tok, kp["emb"], kp["pos"], kp["mask"], kp["hsel"], kp["bones"],
      kp["wqkvs"], kp["wos"], kp["w13s"], kp["w2s"], kp["wuT"], kp["bu"])
    return logits.reshape(B, S, N_VOCAB)


def transformer_forward_ref(tokens, params):
    """Pure-JAX reference mirroring the PyTorch module semantics."""
    B, S = tokens.shape
    H, hd = N_HEADS, N_HEAD_DIM
    x = params["embedding"][tokens] + params["pos_encoding"][:S][None, :, :]
    mask = params["mask"][:S, :S]

    def rms(x, g):
        ms = jnp.mean(x * x, axis=-1, keepdims=True)
        return x * g * jax.lax.rsqrt(ms + 1e-8)

    for blk in params["blocks"]:
        h = rms(x, blk["g1"])
        q = h @ blk["wq"].T
        k = h @ blk["wk"].T
        v = h @ blk["wv"].T
        qh = q.reshape(B, S, H, hd).transpose(0, 2, 1, 3)
        kh = k.reshape(B, S, H, hd).transpose(0, 2, 1, 3)
        vh = v.reshape(B, S, H, hd).transpose(0, 2, 1, 3)
        s = jnp.einsum("bhqd,bhkd->bhqk", qh, kh) / math.sqrt(hd) + mask
        p = jax.nn.softmax(s, axis=-1)
        oh = jnp.einsum("bhqk,bhkd->bhqd", p, vh)
        o = oh.transpose(0, 2, 1, 3).reshape(B, S, N_DIM) @ blk["wo"].T
        x = x + o
        h2 = rms(x, blk["g2"])
        x = x + (jax.nn.silu(h2 @ blk["w1"].T) * (h2 @ blk["w3"].T)) @ blk["w2"].T
    return x @ params["unembed_w"].T + params["unembed_b"]


# ------------------------------- main ---------------------------------------
if __name__ == "__main__":
    key = jax.random.PRNGKey(0)
    k_param, k_tok = jax.random.split(key)
    params = init_params(k_param)
    tokens = jax.random.randint(k_tok, (N_BATCH, N_CTX), 0, N_VOCAB, dtype=jnp.int32)

    # All repacking / transposes / weight folds done once, outside the jitted forward.
    kparams = prepare_kernel_params(params, N_BATCH, N_CTX)

    fwd = jax.jit(transformer_forward)
    logits = jax.block_until_ready(fwd(tokens, kparams))
    assert logits.shape == (N_BATCH, N_CTX, N_VOCAB)

    ref = jax.block_until_ready(transformer_forward_ref(tokens, params))
    max_err = float(jnp.max(jnp.abs(logits - ref)))
    assert np.isfinite(max_err) and max_err < 5e-2, f"mismatch vs reference: {max_err}"

    print("KERNEL_OK")
</pallas_src>

<mosaic_0001>
module attributes {stable_mosaic.version = 11 : i64} {
  func.func @_forward_kernel(%arg0: memref<16x1xi32, #tpu.memory_space<vmem>>, %arg1: memref<64x32xf32, #tpu.memory_space<vmem>>, %arg2: memref<16x32xf32, #tpu.memory_space<vmem>>, %arg3: memref<16x64xf32, #tpu.memory_space<vmem>>, %arg4: memref<64x32xf32, #tpu.memory_space<vmem>>, %arg5: memref<64x64xf32, #tpu.memory_space<vmem>>, %arg6: memref<2x32x96xf32, #tpu.memory_space<vmem>>, %arg7: memref<2x32x32xf32, #tpu.memory_space<vmem>>, %arg8: memref<2x32x64xf32, #tpu.memory_space<vmem>>, %arg9: memref<2x32x32xf32, #tpu.memory_space<vmem>>, %arg10: memref<32x64xf32, #tpu.memory_space<vmem>>, %arg11: memref<1x64xf32, #tpu.memory_space<vmem>>, %arg12: memref<16x64xf32, #tpu.memory_space<vmem>>) attributes {dimension_semantics = [], scalar_prefetch = 0 : i64, scratch_operands = 0 : i64, tpu.core_type = #tpu.core_type<tc>} {
    %0 = tpu.iota {dimensions = array<i32: 1>} : vector<16x64xi32>
    %c0 = arith.constant 0 : index
    %c0_0 = arith.constant 0 : index
    %1 = vector.load %arg0[%c0, %c0_0] : memref<16x1xi32, #tpu.memory_space<vmem>>, vector<16x1xi32>
    %2 = vector.broadcast %1 : vector<16x1xi32> to vector<16x64xi32>
    %3 = arith.cmpi eq, %0, %2 : vector<16x64xi32>
    %4 = arith.extui %3 : vector<16x64xi1> to vector<16x64xi32>
    %5 = arith.sitofp %4 : vector<16x64xi32> to vector<16x64xf32>
    %c0_1 = arith.constant 0 : index
    %c0_2 = arith.constant 0 : index
    %6 = vector.load %arg1[%c0_1, %c0_2] : memref<64x32xf32, #tpu.memory_space<vmem>>, vector<64x32xf32>
    %cst = arith.constant dense<0.000000e+00> : vector<16x32xf32>
    %7 = tpu.matmul %5, %6, %cst {dimension_numbers = #tpu.dot_dimension_numbers<[1], [0], [0], [1], [0, 0, 1, 1], [], []>} : vector<16x64xf32>, vector<64x32xf32>, vector<16x32xf32> -> vector<16x32xf32>
    %c0_3 = arith.constant 0 : index
    %c0_4 = arith.constant 0 : index
    %8 = vector.load %arg2[%c0_3, %c0_4] : memref<16x32xf32, #tpu.memory_space<vmem>>, vector<16x32xf32>
    %9 = arith.addf %7, %8 : vector<16x32xf32>
    %c0_5 = arith.constant 0 : index
    %c0_6 = arith.constant 0 : index
    %10 = vector.load %arg3[%c0_5, %c0_6] : memref<16x64xf32, #tpu.memory_space<vmem>>, vector<16x64xf32>
    %c0_7 = arith.constant 0 : index
    %c0_8 = arith.constant 0 : index
    %11 = vector.load %arg4[%c0_7, %c0_8] : memref<64x32xf32, #tpu.memory_space<vmem>>, vector<64x32xf32>
    %c0_9 = arith.constant 0 : index
    %c0_10 = arith.constant 0 : index
    %12 = vector.load %arg5[%c0_9, %c0_10] : memref<64x64xf32, #tpu.memory_space<vmem>>, vector<64x64xf32>
    %13 = arith.mulf %9, %9 : vector<16x32xf32>
    %cst_11 = arith.constant dense<0.000000e+00> : vector<16xf32>
    %14 = vector.multi_reduction <add>, %13, %cst_11 [1] : vector<16x32xf32> to vector<16xf32>
    %15 = vector.shape_cast %14 : vector<16xf32> to vector<16x1xf32>
    %cst_12 = arith.constant 3.200000e+01 : f32
    %16 = vector.broadcast %cst_12 : f32 to vector<16x1xf32>
    %17 = arith.divf %15, %16 : vector<16x1xf32>
    %cst_13 = arith.constant 9.99999993E-9 : f32
    %18 = vector.broadcast %cst_13 : f32 to vector<16x1xf32>
    %19 = arith.addf %17, %18 : vector<16x1xf32>
    %20 = math.rsqrt %19 : vector<16x1xf32>
    %21 = vector.broadcast %20 : vector<16x1xf32> to vector<16x32xf32>
    %22 = arith.mulf %9, %21 : vector<16x32xf32>
    %c0_14 = arith.constant 0 : index
    %c0_15 = arith.constant 0 : index
    %c0_16 = arith.constant 0 : index
    %23 = vector.load %arg6[%c0_14, %c0_15, %c0_16] : memref<2x32x96xf32, #tpu.memory_space<vmem>>, vector<1x32x96xf32>
    %24 = vector.shape_cast %23 : vector<1x32x96xf32> to vector<32x96xf32>
    %cst_17 = arith.constant dense<0.000000e+00> : vector<16x96xf32>
    %25 = tpu.matmul %22, %24, %cst_17 {dimension_numbers = #tpu.dot_dimension_numbers<[1], [0], [0], [1], [0, 0, 1, 1], [], []>} : vector<16x32xf32>, vector<32x96xf32>, vector<16x96xf32> -> vector<16x96xf32>
    %26 = vector.extract_strided_slice %25 {offsets = [0, 0], sizes = [16, 32], strides = [1, 1]} : vector<16x96xf32> to vector<16x32xf32>
    %27 = vector.extract_strided_slice %25 {offsets = [0, 32], sizes = [16, 32], strides = [1, 1]} : vector<16x96xf32> to vector<16x32xf32>
    %28 = vector.extract_strided_slice %25 {offsets = [0, 64], sizes = [16, 32], strides = [1, 1]} : vector<16x96xf32> to vector<16x32xf32>
    %29 = tpu.concatenate %27, %27, %27, %27 in 0 : vector<16x32xf32>, vector<16x32xf32>, vector<16x32xf32>, vector<16x32xf32> -> vector<64x32xf32>
    %30 = arith.mulf %29, %11 : vector<64x32xf32>
    %31 = tpu.concatenate %28, %28, %28, %28 in 0 : vector<16x32xf32>, vector<16x32xf32>, vector<16x32xf32>, vector<16x32xf32> -> vector<64x32xf32>
    %32 = arith.mulf %31, %11 : vector<64x32xf32>
    %cst_18 = arith.constant dense<0.000000e+00> : vector<16x64xf32>
    %33 = tpu.matmul %26, %30, %cst_18 {dimension_numbers = #tpu.dot_dimension_numbers<[1], [1], [0], [0], [0, 0, 1, 0], [], []>} : vector<16x32xf32>, vector<64x32xf32>, vector<16x64xf32> -> vector<16x64xf32>
    %34 = arith.addf %33, %10 : vector<16x64xf32>
    %cst_19 = arith.constant dense<0xFF800000> : vector<16xf32>
    %35 = vector.multi_reduction <maximumf>, %34, %cst_19 [1] : vector<16x64xf32> to vector<16xf32>
    %36 = vector.shape_cast %35 : vector<16xf32> to vector<16x1xf32>
    %37 = vector.broadcast %36 : vector<16x1xf32> to vector<16x64xf32>
    %38 = arith.subf %34, %37 : vector<16x64xf32>
    %39 = math.exp %38 : vector<16x64xf32>
    %cst_20 = arith.constant dense<0.000000e+00> : vector<16x64xf32>
    %40 = tpu.matmul %39, %12, %cst_20 {dimension_numbers = #tpu.dot_dimension_numbers<[1], [0], [0], [1], [0, 0, 1, 1], [], []>} : vector<16x64xf32>, vector<64x64xf32>, vector<16x64xf32> -> vector<16x64xf32>
    %41 = tpu.reciprocal %40 {approx = true} : vector<16x64xf32> -> vector<16x64xf32>
    %42 = arith.mulf %39, %41 : vector<16x64xf32>
    %cst_21 = arith.constant dense<0.000000e+00> : vector<16x32xf32>
    %43 = tpu.matmul %42, %32, %cst_21 {dimension_numbers = #tpu.dot_dimension_numbers<[1], [0], [0], [1], [0, 0, 1, 1], [], []>} : vector<16x64xf32>, vector<64x32xf32>, vector<16x32xf32> -> vector<16x32xf32>
    %c0_22 = arith.constant 0 : index
    %c0_23 = arith.constant 0 : index
    %c0_24 = arith.constant 0 : index
    %44 = vector.load %arg7[%c0_22, %c0_23, %c0_24] : memref<2x32x32xf32, #tpu.memory_space<vmem>>, vector<1x32x32xf32>
    %45 = vector.shape_cast %44 : vector<1x32x32xf32> to vector<32x32xf32>
    %cst_25 = arith.constant dense<0.000000e+00> : vector<16x32xf32>
    %46 = tpu.matmul %43, %45, %cst_25 {dimension_numbers = #tpu.dot_dimension_numbers<[1], [0], [0], [1], [0, 0, 1, 1], [], []>} : vector<16x32xf32>, vector<32x32xf32>, vector<16x32xf32> -> vector<16x32xf32>
    %47 = arith.addf %9, %46 : vector<16x32xf32>
    %48 = arith.mulf %47, %47 : vector<16x32xf32>
    %cst_26 = arith.constant dense<0.000000e+00> : vector<16xf32>
    %49 = vector.multi_reduction <add>, %48, %cst_26 [1] : vector<16x32xf32> to vector<16xf32>
    %50 = vector.shape_cast %49 : vector<16xf32> to vector<16x1xf32>
    %cst_27 = arith.constant 3.200000e+01 : f32
    %51 = vector.broadcast %cst_27 : f32 to vector<16x1xf32>
    %52 = arith.divf %50, %51 : vector<16x1xf32>
    %cst_28 = arith.constant 9.99999993E-9 : f32
    %53 = vector.broadcast %cst_28 : f32 to vector<16x1xf32>
    %54 = arith.addf %52, %53 : vector<16x1xf32>
    %55 = math.rsqrt %54 : vector<16x1xf32>
    %56 = vector.broadcast %55 : vector<16x1xf32> to vector<16x32xf32>
    %57 = arith.mulf %47, %56 : vector<16x32xf32>
    %c0_29 = arith.constant 0 : index
    %c0_30 = arith.constant 0 : index
    %c0_31 = arith.constant 0 : index
    %58 = vector.load %arg8[%c0_29, %c0_30, %c0_31] : memref<2x32x64xf32, #tpu.memory_space<vmem>>, vector<1x32x64xf32>
    %59 = vector.shape_cast %58 : vector<1x32x64xf32> to vector<32x64xf32>
    %cst_32 = arith.constant dense<0.000000e+00> : vector<16x64xf32>
    %60 = tpu.matmul %57, %59, %cst_32 {dimension_numbers = #tpu.dot_dimension_numbers<[1], [0], [0], [1], [0, 0, 1, 1], [], []>} : vector<16x32xf32>, vector<32x64xf32>, vector<16x64xf32> -> vector<16x64xf32>
    %61 = vector.extract_strided_slice %60 {offsets = [0, 0], sizes = [16, 32], strides = [1, 1]} : vector<16x64xf32> to vector<16x32xf32>
    %62 = vector.extract_strided_slice %60 {offsets = [0, 32], sizes = [16, 32], strides = [1, 1]} : vector<16x64xf32> to vector<16x32xf32>
    %cst_33 = arith.constant 0.000000e+00 : f32
    %63 = vector.broadcast %cst_33 : f32 to vector<16x32xf32>
    %64 = arith.subf %63, %61 : vector<16x32xf32>
    %65 = math.exp %64 : vector<16x32xf32>
    %cst_34 = arith.constant 1.000000e+00 : f32
    %66 = vector.broadcast %cst_34 : f32 to vector<16x32xf32>
    %67 = arith.addf %66, %65 : vector<16x32xf32>
    %68 = tpu.reciprocal %67 {approx = true} : vector<16x32xf32> -> vector<16x32xf32>
    %69 = arith.mulf %61, %68 : vector<16x32xf32>
    %70 = arith.mulf %69, %62 : vector<16x32xf32>
    %c0_35 = arith.constant 0 : index
    %c0_36 = arith.constant 0 : index
    %c0_37 = arith.constant 0 : index
    %71 = vector.load %arg9[%c0_35, %c0_36, %c0_37] : memref<2x32x32xf32, #tpu.memory_space<vmem>>, vector<1x32x32xf32>
    %72 = vector.shape_cast %71 : vector<1x32x32xf32> to vector<32x32xf32>
    %cst_38 = arith.constant dense<0.000000e+00> : vector<16x32xf32>
    %73 = tpu.matmul %70, %72, %cst_38 {dimension_numbers = #tpu.dot_dimension_numbers<[1], [0], [0], [1], [0, 0, 1, 1], [], []>} : vector<16x32xf32>, vector<32x32xf32>, vector<16x32xf32> -> vector<16x32xf32>
    %74 = arith.addf %47, %73 : vector<16x32xf32>
    %75 = arith.mulf %74, %74 : vector<16x32xf32>
    %cst_39 = arith.constant dense<0.000000e+00> : vector<16xf32>
    %76 = vector.multi_reduction <add>, %75, %cst_39 [1] : vector<16x32xf32> to vector<16xf32>
    %77 = vector.shape_cast %76 : vector<16xf32> to vector<16x1xf32>
    %cst_40 = arith.constant 3.200000e+01 : f32
    %78 = vector.broadcast %cst_40 : f32 to vector<16x1xf32>
    %79 = arith.divf %77, %78 : vector<16x1xf32>
    %cst_41 = arith.constant 9.99999993E-9 : f32
    %80 = vector.broadcast %cst_41 : f32 to vector<16x1xf32>
    %81 = arith.addf %79, %80 : vector<16x1xf32>
    %82 = math.rsqrt %81 : vector<16x1xf32>
    %83 = vector.broadcast %82 : vector<16x1xf32> to vector<16x32xf32>
    %84 = arith.mulf %74, %83 : vector<16x32xf32>
    %c1 = arith.constant 1 : index
    %c0_42 = arith.constant 0 : index
    %c0_43 = arith.constant 0 : index
    %85 = vector.load %arg6[%c1, %c0_42, %c0_43] : memref<2x32x96xf32, #tpu.memory_space<vmem>>, vector<1x32x96xf32>
    %86 = vector.shape_cast %85 : vector<1x32x96xf32> to vector<32x96xf32>
    %cst_44 = arith.constant dense<0.000000e+00> : vector<16x96xf32>
    %87 = tpu.matmul %84, %86, %cst_44 {dimension_numbers = #tpu.dot_dimension_numbers<[1], [0], [0], [1], [0, 0, 1, 1], [], []>} : vector<16x32xf32>, vector<32x96xf32>, vector<16x96xf32> -> vector<16x96xf32>
    %88 = vector.extract_strided_slice %87 {offsets = [0, 0], sizes = [16, 32], strides = [1, 1]} : vector<16x96xf32> to vector<16x32xf32>
    %89 = vector.extract_strided_slice %87 {offsets = [0, 32], sizes = [16, 32], strides = [1, 1]} : vector<16x96xf32> to vector<16x32xf32>
    %90 = vector.extract_strided_slice %87 {offsets = [0, 64], sizes = [16, 32], strides = [1, 1]} : vector<16x96xf32> to vector<16x32xf32>
    %91 = tpu.concatenate %89, %89, %89, %89 in 0 : vector<16x32xf32>, vector<16x32xf32>, vector<16x32xf32>, vector<16x32xf32> -> vector<64x32xf32>
    %92 = arith.mulf %91, %11 : vector<64x32xf32>
    %93 = tpu.concatenate %90, %90, %90, %90 in 0 : vector<16x32xf32>, vector<16x32xf32>, vector<16x32xf32>, vector<16x32xf32> -> vector<64x32xf32>
    %94 = arith.mulf %93, %11 : vector<64x32xf32>
    %cst_45 = arith.constant dense<0.000000e+00> : vector<16x64xf32>
    %95 = tpu.matmul %88, %92, %cst_45 {dimension_numbers = #tpu.dot_dimension_numbers<[1], [1], [0], [0], [0, 0, 1, 0], [], []>} : vector<16x32xf32>, vector<64x32xf32>, vector<16x64xf32> -> vector<16x64xf32>
    %96 = arith.addf %95, %10 : vector<16x64xf32>
    %cst_46 = arith.constant dense<0xFF800000> : vector<16xf32>
    %97 = vector.multi_reduction <maximumf>, %96, %cst_46 [1] : vector<16x64xf32> to vector<16xf32>
    %98 = vector.shape_cast %97 : vector<16xf32> to vector<16x1xf32>
    %99 = vector.broadcast %98 : vector<16x1xf32> to vector<16x64xf32>
    %100 = arith.subf %96, %99 : vector<16x64xf32>
    %101 = math.exp %100 : vector<16x64xf32>
    %cst_47 = arith.constant dense<0.000000e+00> : vector<16x64xf32>
    %102 = tpu.matmul %101, %12, %cst_47 {dimension_numbers = #tpu.dot_dimension_numbers<[1], [0], [0], [1], [0, 0, 1, 1], [], []>} : vector<16x64xf32>, vector<64x64xf32>, vector<16x64xf32> -> vector<16x64xf32>
    %103 = tpu.reciprocal %102 {approx = true} : vector<16x64xf32> -> vector<16x64xf32>
    %104 = arith.mulf %101, %103 : vector<16x64xf32>
    %cst_48 = arith.constant dense<0.000000e+00> : vector<16x32xf32>
    %105 = tpu.matmul %104, %94, %cst_48 {dimension_numbers = #tpu.dot_dimension_numbers<[1], [0], [0], [1], [0, 0, 1, 1], [], []>} : vector<16x64xf32>, vector<64x32xf32>, vector<16x32xf32> -> vector<16x32xf32>
    %c1_49 = arith.constant 1 : index
    %c0_50 = arith.constant 0 : index
    %c0_51 = arith.constant 0 : index
    %106 = vector.load %arg7[%c1_49, %c0_50, %c0_51] : memref<2x32x32xf32, #tpu.memory_space<vmem>>, vector<1x32x32xf32>
    %107 = vector.shape_cast %106 : vector<1x32x32xf32> to vector<32x32xf32>
    %cst_52 = arith.constant dense<0.000000e+00> : vector<16x32xf32>
    %108 = tpu.matmul %105, %107, %cst_52 {dimension_numbers = #tpu.dot_dimension_numbers<[1], [0], [0], [1], [0, 0, 1, 1], [], []>} : vector<16x32xf32>, vector<32x32xf32>, vector<16x32xf32> -> vector<16x32xf32>
    %109 = arith.addf %74, %108 : vector<16x32xf32>
    %110 = arith.mulf %109, %109 : vector<16x32xf32>
    %cst_53 = arith.constant dense<0.000000e+00> : vector<16xf32>
    %111 = vector.multi_reduction <add>, %110, %cst_53 [1] : vector<16x32xf32> to vector<16xf32>
    %112 = vector.shape_cast %111 : vector<16xf32> to vector<16x1xf32>
    %cst_54 = arith.constant 3.200000e+01 : f32
    %113 = vector.broadcast %cst_54 : f32 to vector<16x1xf32>
    %114 = arith.divf %112, %113 : vector<16x1xf32>
    %cst_55 = arith.constant 9.99999993E-9 : f32
    %115 = vector.broadcast %cst_55 : f32 to vector<16x1xf32>
    %116 = arith.addf %114, %115 : vector<16x1xf32>
    %117 = math.rsqrt %116 : vector<16x1xf32>
    %118 = vector.broadcast %117 : vector<16x1xf32> to vector<16x32xf32>
    %119 = arith.mulf %109, %118 : vector<16x32xf32>
    %c1_56 = arith.constant 1 : index
    %c0_57 = arith.constant 0 : index
    %c0_58 = arith.constant 0 : index
    %120 = vector.load %arg8[%c1_56, %c0_57, %c0_58] : memref<2x32x64xf32, #tpu.memory_space<vmem>>, vector<1x32x64xf32>
    %121 = vector.shape_cast %120 : vector<1x32x64xf32> to vector<32x64xf32>
    %cst_59 = arith.constant dense<0.000000e+00> : vector<16x64xf32>
    %122 = tpu.matmul %119, %121, %cst_59 {dimension_numbers = #tpu.dot_dimension_numbers<[1], [0], [0], [1], [0, 0, 1, 1], [], []>} : vector<16x32xf32>, vector<32x64xf32>, vector<16x64xf32> -> vector<16x64xf32>
    %123 = vector.extract_strided_slice %122 {offsets = [0, 0], sizes = [16, 32], strides = [1, 1]} : vector<16x64xf32> to vector<16x32xf32>
    %124 = vector.extract_strided_slice %122 {offsets = [0, 32], sizes = [16, 32], strides = [1, 1]} : vector<16x64xf32> to vector<16x32xf32>
    %cst_60 = arith.constant 0.000000e+00 : f32
    %125 = vector.broadcast %cst_60 : f32 to vector<16x32xf32>
    %126 = arith.subf %125, %123 : vector<16x32xf32>
    %127 = math.exp %126 : vector<16x32xf32>
    %cst_61 = arith.constant 1.000000e+00 : f32
    %128 = vector.broadcast %cst_61 : f32 to vector<16x32xf32>
    %129 = arith.addf %128, %127 : vector<16x32xf32>
    %130 = tpu.reciprocal %129 {approx = true} : vector<16x32xf32> -> vector<16x32xf32>
    %131 = arith.mulf %123, %130 : vector<16x32xf32>
    %132 = arith.mulf %131, %124 : vector<16x32xf32>
    %c1_62 = arith.constant 1 : index
    %c0_63 = arith.constant 0 : index
    %c0_64 = arith.constant 0 : index
    %133 = vector.load %arg9[%c1_62, %c0_63, %c0_64] : memref<2x32x32xf32, #tpu.memory_space<vmem>>, vector<1x32x32xf32>
    %134 = vector.shape_cast %133 : vector<1x32x32xf32> to vector<32x32xf32>
    %cst_65 = arith.constant dense<0.000000e+00> : vector<16x32xf32>
    %135 = tpu.matmul %132, %134, %cst_65 {dimension_numbers = #tpu.dot_dimension_numbers<[1], [0], [0], [1], [0, 0, 1, 1], [], []>} : vector<16x32xf32>, vector<32x32xf32>, vector<16x32xf32> -> vector<16x32xf32>
    %136 = arith.addf %109, %135 : vector<16x32xf32>
    %c0_66 = arith.constant 0 : index
    %c0_67 = arith.constant 0 : index
    %137 = vector.load %arg10[%c0_66, %c0_67] : memref<32x64xf32, #tpu.memory_space<vmem>>, vector<32x64xf32>
    %cst_68 = arith.constant dense<0.000000e+00> : vector<16x64xf32>
    %138 = tpu.matmul %136, %137, %cst_68 {dimension_numbers = #tpu.dot_dimension_numbers<[1], [0], [0], [1], [0, 0, 1, 1], [], []>} : vector<16x32xf32>, vector<32x64xf32>, vector<16x64xf32> -> vector<16x64xf32>
    %c0_69 = arith.constant 0 : index
    %c0_70 = arith.constant 0 : index
    %139 = vector.load %arg11[%c0_69, %c0_70] : memref<1x64xf32, #tpu.memory_space<vmem>>, vector<1x64xf32>
    %140 = vector.broadcast %139 : vector<1x64xf32> to vector<16x64xf32>
    %141 = arith.addf %138, %140 : vector<16x64xf32>
    %c0_71 = arith.constant 0 : index
    %c0_72 = arith.constant 0 : index
    %142 = vector.load %arg12[%c0_71, %c0_72] : memref<16x64xf32, #tpu.memory_space<vmem>>, vector<16x64xf32>
    tpu.vector_store %arg12[%c0_71, %c0_72], %141 {strides = array<i32>} : memref<16x64xf32, #tpu.memory_space<vmem>>, vector<16x64xf32>,
    return
  }
}

</mosaic_0001>

<bundles_post_ra>
// kernel: transformer_forward.1
= control target key start
LH: loop header
LB: loop body
LE: loop exit
PB: predicated region body
PF: predicated region fallthrough
CT: control target
= control target key end

     0   :  { %17 = vsyncpa [#allocation3], 0  ;;  %s3419_s0 = inlined_call_operand.vmem [shape: s32[16,1], index: 0, kind: input, shape index: {}]   ;;  %s3420_s1 = inlined_call_operand.vmem [shape: f32[64,32], index: 1, kind: input, shape index: {}]   ;;  %s3421_s2 = inlined_call_operand.hbm [shape: f32[16,32], index: 2, kind: input, shape index: {}]   ;;  %s3422_s3 = inlined_call_operand.hbm [shape: f32[16,64], index: 3, kind: input, shape index: {}]   ;;  %s3423_s4 = inlined_call_operand.vmem [shape: f32[64,32], index: 4, kind: input, shape index: {}]   ;;  %s3424_s5 = inlined_call_operand.vmem [shape: f32[64,64], index: 5, kind: input, shape index: {}]   ;;  %s3425_s6 = inlined_call_operand.vmem [shape: f32[2,32,96], index: 6, kind: input, shape index: {}]   ;;  %s3426_s7 = inlined_call_operand.vmem [shape: f32[2,32,32], index: 7, kind: input, shape index: {}]   ;;  %s3427_s8 = inlined_call_operand.hbm [shape: f32[2,32,64], index: 8, kind: input, shape index: {}]   ;;  %s3428_s9 = inlined_call_operand.hbm [shape: f32[2,32,32], index: 9, kind: input, shape index: {}]   ;;  %s3429_s10 = inlined_call_operand.hbm [shape: f32[32,64], index: 10, kind: input, shape index: {}]   ;;  %s3430_s11 = inlined_call_operand.vmem [shape: f32[1,64], index: 11, kind: input, shape index: {}]   ;;  %s3431_s12 = inlined_call_operand.hbm [shape: f32[16,64], index: 12, kind: output, shape index: {}]  }
   0x1   :  { %18 = vsyncpa [#allocation6], 0 }
   0x2   :  { %19 = vsyncpa [#allocation9], 0 }
   0x3   :  { %20 = vsyncpa [#allocation4], 0  ;;  %s2798_s21 = smov [#allocation5]   ;;  %s2799_s23 = smov [#allocation8]  }
   0x4   :  { %s42_s22 = sshll.u32 %s2798_s21, 4  ;;  %s74_s24 = sshll.u32 %s2799_s23, 4  ;;  %s43_s22 = int_to_ptr.vmem [resolvable:$true] %s42_s22  ;;  %s2876_s24 = int_to_ptr.vmem [resolvable:$true] %s74_s24 }
   0x5   :  { %s2658_s27 = scalar_lea.hbm %s3422_s3, 256 }
   0x6   :  { %p2659_p0 = scmp.ne.s32.totalorder %s3422_s3, %s2658_s27  ;;  %p2662_p1 = scmp.lt.u32.totalorder %s2658_s27, %s3422_s3 }
   0x8   :  { %p2664_p2 = pnand %p2662_p1, %p2659_p0 }
   0xa   :  { %2667 = shalt.err (!%p2664_p2)
}
   0xb   :  { %s2668_s14 = scalar_lea.vmem %s43_s22, 256  ;;  %p2673_p4 = scmp.lt.s32.totalorder %s43_s22, %s43_s22 }
   0xc   :  { %p2669_p3 = scmp.ne.s32.totalorder %s43_s22, %s2668_s14  ;;  %p2674_p5 = scmp.lt.s32.totalorder %s2668_s14, %s2668_s14 }
   0xe   :  { %p2675_p6 = por %p2674_p5, %p2673_p4 }
  0x10   :  { %p2676_p7 = pnand %p2675_p6, %p2669_p3 }
  0x12   :  { %2679 = shalt.err (!%p2676_p7)
}
  0x13   :  { %s2800_s15 = smov 128   ;;  %s2801_s16 = smov 8  }
  0x14   :  { %48 = dma.hbm_to_vmem [thread:$0]  %s3422_s3, 256, %s43_s22, [#allocation6], %s2800_s15, %s2800_s15, %s2801_s16  }
  0x15   :  { %s2680_s21 = scalar_lea.hbm %s3428_s9, 1024 }
  0x16   :  { %p2681_p8 = scmp.ne.s32.totalorder %s3428_s9, %s2680_s21  ;;  %p2684_p9 = scmp.lt.u32.totalorder %s2680_s21, %s3428_s9 }
  0x18   :  { %p2686_p10 = pnand %p2684_p9, %p2681_p8 }
  0x1a   :  { %2689 = shalt.err (!%p2686_p10)
}
  0x1b   :  { %s2690_s28 = scalar_lea.vmem %s2876_s24, 1024  ;;  %p2695_p12 = scmp.lt.s32.totalorder %s2876_s24, %s2876_s24 }
  0x1c   :  { %p2691_p11 = scmp.ne.s32.totalorder %s2876_s24, %s2690_s28  ;;  %p2696_p13 = scmp.lt.s32.totalorder %s2690_s28, %s2690_s28 }
  0x1e   :  { %p2697_p0 = por %p2696_p13, %p2695_p12 }
  0x20   :  { %p2698_p1 = pnand %p2697_p0, %p2691_p11 }
  0x22   :  { %2701 = shalt.err (!%p2698_p1)
}
  0x23   :  { %80 = dma.hbm_to_vmem [thread:$0]  %s3428_s9, 1024, %s2876_s24, [#allocation9], %s2800_s15, %s2800_s15, %s2801_s16  }
  0x24   :  { %s2802_s29 = smov [#allocation2]   ;;  %s2803_s13 = smov [#allocation7]  }
  0x25   :  { %s30_s30 = sshll.u32 %s2802_s29, 4  ;;  %s62_s14 = sshll.u32 %s2803_s13, 4  ;;  %s31_s30 = int_to_ptr.vmem [resolvable:$true] %s30_s30  ;;  %s2913_s14 = int_to_ptr.vmem [resolvable:$true] %s62_s14 }
  0x26   :  { %s2702_s19 = scalar_lea.hbm %s3421_s2, 256 }
  0x27   :  { %p2703_p2 = scmp.ne.s32.totalorder %s3421_s2, %s2702_s19  ;;  %p2706_p3 = scmp.lt.u32.totalorder %s2702_s19, %s3421_s2 }
  0x29   :  { %p2708_p4 = pnand %p2706_p3, %p2703_p2 }
  0x2b   :  { %2711 = shalt.err (!%p2708_p4)
}
  0x2c   :  { %s2712_s9 = scalar_lea.vmem %s31_s30, 256  ;;  %p2717_p6 = scmp.lt.s32.totalorder %s31_s30, %s31_s30 }
  0x2d   :  { %p2713_p5 = scmp.ne.s32.totalorder %s31_s30, %s2712_s9  ;;  %p2718_p7 = scmp.lt.s32.totalorder %s2712_s9, %s2712_s9 }
  0x2f   :  { %p2719_p8 = por %p2718_p7, %p2717_p6 }
  0x31   :  { %p2720_p9 = pnand %p2719_p8, %p2713_p5 }
  0x33   :  { %2723 = shalt.err (!%p2720_p9)
}
  0x34   :  { %36 = dma.hbm_to_vmem [thread:$0]  %s3421_s2, 256, %s31_s30, [#allocation3], %s2800_s15, %s2800_s15, %s2801_s16  }
  0x35   :  { %s2724_s3 = scalar_lea.hbm %s3427_s8, 1024 }
  0x36   :  { %p2725_p10 = scmp.ne.s32.totalorder %s3427_s8, %s2724_s3  ;;  %p2728_p11 = scmp.lt.u32.totalorder %s2724_s3, %s3427_s8 }
  0x38   :  { %p2730_p12 = pnand %p2728_p11, %p2725_p10 }
  0x3a   :  { %2733 = shalt.err (!%p2730_p12)
}
  0x3b   :  { %s2734_s18 = scalar_lea.vmem %s2913_s14, 1024  ;;  %p2739_p0 = scmp.lt.s32.totalorder %s2913_s14, %s2913_s14 }
  0x3c   :  { %p2735_p13 = scmp.ne.s32.totalorder %s2913_s14, %s2734_s18  ;;  %p2740_p1 = scmp.lt.s32.totalorder %s2734_s18, %s2734_s18 }
  0x3e   :  { %p2741_p2 = por %p2740_p1, %p2739_p0 }
  0x40   :  { %p2742_p3 = pnand %p2741_p2, %p2735_p13 }
  0x42   :  { %2745 = shalt.err (!%p2742_p3)
}
  0x43   :  { %68 = dma.hbm_to_vmem [thread:$0]  %s3427_s8, 1024, %s2913_s14, [#allocation6], %s2800_s15, %s2800_s15, %s2801_s16  }
  0x44   :  { %s2804_s19 = smov [#allocation10]   ;;  %s2746_s25 = scalar_lea.hbm %s3429_s10, 512 }
  0x45   :  { %s86_s20 = sshll.u32 %s2804_s19, 4  ;;  %p2747_p4 = scmp.ne.s32.totalorder %s3429_s10, %s2746_s25  ;;  %s87_s20 = int_to_ptr.vmem [resolvable:$true] %s86_s20 }
  0x46   :  { %p2750_p5 = scmp.lt.u32.totalorder %s2746_s25, %s3429_s10 }
  0x48   :  { %p2752_p6 = pnand %p2750_p5, %p2747_p4 }
  0x4a   :  { %2755 = shalt.err (!%p2752_p6)
}
  0x4b   :  { %s2756_s28 = scalar_lea.vmem %s87_s20, 512  ;;  %p2761_p8 = scmp.lt.s32.totalorder %s87_s20, %s87_s20 }
  0x4c   :  { %p2757_p7 = scmp.ne.s32.totalorder %s87_s20, %s2756_s28  ;;  %p2762_p9 = scmp.lt.s32.totalorder %s2756_s28, %s2756_s28 }
  0x4e   :  { %p2763_p10 = por %p2762_p9, %p2761_p8 }
  0x50   :  { %p2764_p11 = pnand %p2763_p10, %p2757_p7 }
  0x52   :  { %2767 = shalt.err (!%p2764_p11)
}
  0x53   :  { %92 = dma.hbm_to_vmem [thread:$0]  %s3429_s10, 512, %s87_s20, [#allocation9], %s2800_s15, %s2800_s15, %s2801_s16  }
  0x54   :  { %2790 = dma.done.wait [#allocation3], 256  }
  0x55   :  { %2791 = vsyncadd [#allocation3], 4294967040 }
  0x56   :  { %2792 = dma.done.wait [#allocation6], 1280  }
  0x57   :  { %2793 = vsyncadd [#allocation6], 4294966016 }
  0x58   :  { %2794 = dma.done.wait [#allocation9], 1536  }
  0x59   :  { %2795 = vsyncadd [#allocation9], 4294965760  ;;  %v2805_v0 = vmov 0   ;;  %v112_v1 = vld [vmem:[%s3419_s0] sm:$0xff]  ;;  %v127_v3 = vld [vmem:[%s3420_s1 + $0x8] sm:$0xff]  ;;  %v110_v15 = vlaneseq  ;;  %vm136_vm0 = vcmask 523264  }
  0x5a   :  { %2529 = vset.pattern.permute.xlu0 %v2805_v0  ;;  %v126_v2 = vld [vmem:[%s3420_s1] sm:$0xff]  ;;  %v128_v4 = vld [vmem:[%s3420_s1 + $0x10] sm:$0xff]  ;;  %v129_v5 = vld [vmem:[%s3420_s1 + $0x18] sm:$0xff]  ;;  %v2806_v18 = vmov 0.0   ;;  %vm238_vm3 = vcmask 261120   ;;  %s2807_s2 = smov 32  }
  0x5b   :  { %115 = vperm.xlu0 %2529, %v112_v1   ;;  %v113_v6 = vld [vmem:[%s3419_s0 + $0x8] sm:$0xff]  ;;  %v2316_v7 = vpack.c.bf16 %v127_v3, %v126_v2  ;;  %v2320_v8 = vpack.c.bf16 %v129_v5, %v128_v4  ;;  %v130_v9 = vld [vmem:[%s3420_s1 + $0x20] sm:$0xff]  ;;  %v132_v12 = vld [vmem:[%s3420_s1 + $0x30] sm:$0xff]  ;;  %v111_v16 = vand.u32 127, %v110_v15  ;;  %s2810_s24 = smov [#allocation11]  }
  0x5c   :  { %v131_v10 = vld [vmem:[%s3420_s1 + $0x28] sm:$0xff]  ;;  %v133_v13 = vld [vmem:[%s3420_s1 + $0x38] sm:$0xff]  ;;  %v134_v23 = vld [vmem:[#allocation2] sm:$0xff] }
  0x5d   :  { %2317 = vmatprep.subr.bf16.mxu0 %v2316_v7  ;;  %v2324_v11 = vpack.c.bf16 %v131_v10, %v130_v9  ;;  %v2328_v14 = vpack.c.bf16 %v133_v13, %v132_v12  ;;  %v135_v22 = vld [vmem:[#allocation2 + $0x8] sm:$0xff]  ;;  %v254_v32 = vld [vmem:[%s3425_s6] sm:$0xff]  ;;  %v255_v33 = vld [vmem:[%s3425_s6 + $0x8] sm:$0xff] }
  0x5e   :  { %2319 = vmatpush3.bf16.msra.mxu0 %v2316_v7  ;;  %v256_v34 = vld [vmem:[%s3425_s6 + $0x10] sm:$0xff]  ;;  %v2332_v35 = vpack.c.bf16 %v255_v33, %v254_v32  ;;  %v257_v36 = vld [vmem:[%s3425_s6 + $0x18] sm:$0xff]  ;;  %v3022_v38 = vld [vmem:[%s3423_s4] sm:$0xff] }
  0x5f   :  { %118 = vperm.xlu0 %2529, %v113_v6   ;;  %2321 = vmatprep.subr.bf16.mxu0 %v2320_v8  ;;  %v2336_v37 = vpack.c.bf16 %v257_v36, %v256_v34  ;;  %v3028_v39 = vld [vmem:[%s3423_s4 + $0x8] sm:$0xff]  ;;  %v3033_v40 = vld [vmem:[%s3423_s4 + $0x10] sm:$0xff]  ;;  %v3045_v42 = vld [vmem:[%s3423_s4 + $0x18] sm:$0xff] }
  0x60   :  { %2333 = vmatprep.subr.bf16.mxu1 %v2332_v35  ;;  %v3039_v41 = vld [vmem:[%s3423_s4 + $0x30] sm:$0xff]  ;;  %v3052_v43 = vld [vmem:[%s3423_s4 + $0x20] sm:$0xff]  ;;  %v3058_v44 = vld [vmem:[%s3423_s4 + $0x28] sm:$0xff] }
  0x61   :  { %2335 = vmatpush3.bf16.msra.mxu1 %v2332_v35  ;;  %v3064_v45 = vld [vmem:[%s3423_s4 + $0x38] sm:$0xff]  ;;  %s2808_s4 = smov 96   ;;  %vm3115_vm4 = vmpackc.low %vm238_vm3, %vm238_vm3  ;;  %v3137_v33 = vld [vmem:[#allocation5 + $0x8] sm:$0xff] }
  0x62   :  { %2323 = vmatpush3.bf16.msra.mxu0 %v2320_v8  ;;  %2337 = vmatprep.subr.bf16.mxu1 %v2336_v37  ;;  %v3139_v34 = vld [vmem:[#allocation5] sm:$0xff] }
  0x63   :  { %2325 = vmatprep.subr.bf16.mxu0 %v2324_v11  ;;  %347 = vrot.lane.b32.xlu0 %v3022_v38, %s2807_s2 }
  0x65   :  { %2339 = vmatpush3.bf16.msra.mxu1 %v2336_v37 }
  0x66   :  { %2327 = vmatpush3.bf16.msra.mxu0 %v2324_v11 }
  0x67   :  { %2329 = vmatprep.subr.bf16.mxu0 %v2328_v14  ;;  %351 = vrot.lane.b32.xlu0 %v3033_v40, %s2807_s2 }
  0x6a   :  { %2331 = vmatpush3.bf16.msra.mxu0 %v2328_v14 }
  0x6b   :  { %353 = vrot.lane.b32.xlu0 %v3045_v42, %s2807_s2 }
  0x6f   :  { %355 = vrot.lane.b32.xlu0 %v3052_v43, %s2807_s2 }
  0x73   :  { %357 = vrot.lane.b32.xlu0 %v3058_v44, %s2807_s2 }
  0x77   :  { %361 = vrot.lane.b32.xlu0 %v3064_v45, %s2807_s2 }
  0xda   :  { %v116_v17 = vpop.permute.xlu0 %115 }
  0xdb   :  { %vm120_vm1 = vcmp.eq.s32.totalorder %v111_v16, %v116_v17 }
  0xdc   :  { %v1901_v19 = vsel %vm120_vm1, 1.0, %v2806_v18 }
  0xdd   :  { %2100 = vmatprep.mubr.msk.f32.mxu0 %vm136_vm0, %v1901_v19 }
  0xde   :  { %v119_v20 = vpop.permute.xlu0 %118 }
  0xdf   :  { %vm121_vm2 = vcmp.eq.s32.totalorder %v111_v16, %v119_v20 }
  0xe0   :  { %v1902_v21 = vsel %vm121_vm2, 1.0, %v2806_v18 }
  0xe1   :  { %2101 = vmatmul.mubr.msk.f32.vlgmr.msra.gmra.mrb[0].mxu0 %vm136_vm0, %v1902_v21 }
  0xe2   :  { %v3071_v56 = vpop.permute.xlu0 %347 }
  0xe6   :  { %v3073_v57 = vpop.permute.xlu0 %351 }
  0xea   :  { %v3075_v58 = vpop.permute.xlu0 %353 }
  0xee   :  { %v3077_v59 = vpop.permute.xlu0 %355 }
  0xf2   :  { %v3079_v60 = vpop.permute.xlu0 %357 }
  0xf6   :  { %v3083_v62 = vpop.permute.xlu0 %361 }
 0x1b4   :  { %v2102_v24 = vpop.f32.mrb[0].mxu0 }
 0x1b5   :  { %v209_v25 = vpop.f32.mrb[1].mxu0  ;;  %v2997_v26 = vadd.f32 %v2102_v24, %v135_v22 }
 0x1b6   :  { %v2999_v27 = vadd.f32 %v209_v25, %v134_v23 }
 0x1b7   :  { %v237_v30 = vmul.f32 %v2997_v26, %v2997_v26 }
 0x1b8   :  { %v236_v28 = vmul.f32 %v2999_v27, %v2999_v27 }
 0x1b9   :  { %v242_v31 = vsel %vm238_vm3, %v237_v30, 0.0 }
 0x1ba   :  { %v239_v29 = vsel %vm238_vm3, %v236_v28, 0.0 }
 0x1bb   :  { %240 = vadd.xlane.f32.xlu1 %v239_v29 }
 0x1bf   :  { %243 = vadd.xlane.f32.xlu1 %v242_v31 }
 0x1d0   :  { %349 = vrot.lane.b32.xlu1 %v3028_v39, %s2807_s2 }
 0x1d4   :  { %359 = vrot.lane.b32.xlu1 %v3039_v41, %s2807_s2  ;;  %s2809_s2 = smov 64  }
 0x248   :  { %v241_v46 = vpop.xlane.xlu1 %240 }
 0x249   :  { %v246_v47 = vmul.f32 0.03125, %v241_v46 }
 0x24b   :  { %v248_v48 = vadd.f32 1e-08, %v246_v47 }
 0x24c   :  { %v244_v49 = vpop.xlane.xlu1 %243 }
 0x24d   :  { %2610 = vrsqrt.f32 %v248_v48  ;;  %v247_v50 = vmul.f32 0.03125, %v244_v49  ;;  %v228_v49 = vld [vmem:[%s3424_s5] sm:$0xff] }
 0x24f   :  { %v249_v51 = vadd.f32 1e-08, %v247_v50  ;;  %v229_v50 = vld [vmem:[%s3424_s5 + $0x8] sm:$0xff] }
 0x250   :  { %v3081_v61 = vpop.permute.xlu1 %349 }
 0x251   :  { %2612 = vrsqrt.f32 %v249_v51  ;;  %v3151_v51 = vpack.c.bf16 %v229_v50, %v228_v49 }
 0x253   :  { %2365 = vmatprep.subr.bf16.mxu0 %v3151_v51 }
 0x254   :  { %v3085_v63 = vpop.permute.xlu1 %359  ;;  %2367 = vmatpush3.bf16.msra.mxu0 %v3151_v51 }
 0x257   :  { %v2611_v52 = vpop.eup %2610 }
 0x258   :  { %v252_v53 = vmul.f32 %v2611_v52, %v2999_v27  ;;  %v230_v52 = vld [vmem:[%s3424_s5 + $0x10] sm:$0xff] }
 0x25a   :  { %2111 = vmatprep.mubr.msk.f32.mxu1 %vm238_vm3, %v252_v53  ;;  %v231_v53 = vld [vmem:[%s3424_s5 + $0x18] sm:$0xff] }
 0x25b   :  { %v2613_v54 = vpop.eup %2612 }
 0x25c   :  { %v253_v55 = vmul.f32 %v2613_v54, %v2997_v26  ;;  %v3161_v54 = vpack.c.bf16 %v231_v53, %v230_v52 }
 0x25e   :  { %2112 = vmatmul.mubr.msk.f32.vlgmr.msra.gmra.mrb[0].mxu1 %vm238_vm3, %v253_v55  ;;  %2369 = vmatprep.subr.bf16.mxu0 %v3161_v54  ;;  %v232_v55 = vld [vmem:[%s3424_s5 + $0x20] sm:$0xff] }
 0x25f   :  { %2371 = vmatpush3.bf16.msra.mxu0 %v3161_v54 }
 0x331   :  { %v3087_v0 = vpop.f32.mrb[0].mxu1 }
 0x332   :  { %v378_v1 = vmul.f32 %v3087_v0, %v3083_v62  ;;  %v3091_v2 = vpop.f32.mrb[1].mxu1  ;;  %v372_v3 = vmul.f32 %v3087_v0, %v3081_v61  ;;  %v374_v4 = vmul.f32 %v3087_v0, %v3075_v58  ;;  %v376_v5 = vmul.f32 %v3087_v0, %v3079_v60 }
 0x333   :  { %v377_v6 = vmul.f32 %v3085_v63, %v3091_v2  ;;  %2130 = vmatprep.mubr.msk.f32.mxu1 %vm238_vm3, %v3091_v2  ;;  %v371_v7 = vmul.f32 %v3071_v56, %v3091_v2  ;;  %v373_v8 = vmul.f32 %v3073_v57, %v3091_v2  ;;  %v375_v9 = vmul.f32 %v3077_v59, %v3091_v2 }
 0x335   :  { %v2545_v10 = vpack.i.bf16 %v378_v1, %v377_v6  ;;  %v2530_v11 = vpack.i.bf16 %v372_v3, %v371_v7  ;;  %v2535_v12 = vpack.i.bf16 %v374_v4, %v373_v8  ;;  %v2540_v13 = vpack.i.bf16 %v376_v5, %v375_v9  ;;  %v233_v1 = vld [vmem:[%s3424_s5 + $0x28] sm:$0xff]  ;;  %v235_v4 = vld [vmem:[%s3424_s5 + $0x38] sm:$0xff] }
 0x336   :  { %v3173_v3 = vpack.c.bf16 %v233_v1, %v232_v55 }
 0x337   :  { %2531 = vrot.lane.b32.xlu1 %v2530_v11, %s2808_s4  ;;  %2536 = vrot.lane.b32.xlu0 %v2535_v12, %s2808_s4 }
 0x338   :  { %2373 = vmatprep.subr.bf16.mxu0 %v3173_v3 }
 0x339   :  { %2375 = vmatpush3.bf16.msra.mxu0 %v3173_v3 }
 0x33b   :  { %2541 = vrot.lane.b32.xlu1 %v2540_v13, %s2808_s4  ;;  %2546 = vrot.lane.b32.xlu0 %v2545_v10, %s2808_s4 }
 0x3a9   :  { %v2532_v14 = vpop.permute.xlu1 %2531  ;;  %v2537_v15 = vpop.permute.xlu0 %2536 }
 0x3aa   :  { %v2534_v16 = vunpack.i.h.bf16 %v2532_v14  ;;  %v2533_v17 = vunpack.i.l.bf16 %v2532_v14  ;;  %v2539_v18 = vunpack.i.h.bf16 %v2537_v15  ;;  %v2538_v19 = vunpack.i.l.bf16 %v2537_v15 }
 0x3ac   :  { %v2340_v21 = vpack.c.bf16 %v2534_v16, %v2533_v17  ;;  %v2346_v22 = vpack.c.bf16 %v2539_v18, %v2538_v19 }
 0x3ad   :  { %v2542_v23 = vpop.permute.xlu1 %2541  ;;  %v2547_v29 = vpop.permute.xlu0 %2546 }
 0x3ae   :  { %2342 = vmatprep.subr.msk.bf16.mxu1 %vm3115_vm4, %v2340_v21  ;;  %v2544_v24 = vunpack.i.h.bf16 %v2542_v23  ;;  %v2543_v25 = vunpack.i.l.bf16 %v2542_v23  ;;  %v2549_v30 = vunpack.i.h.bf16 %v2547_v29  ;;  %v2548_v31 = vunpack.i.l.bf16 %v2547_v29 }
 0x3af   :  { %2345 = vmatpush3.bf16.xpose.msk.msra.mxu1 %vm3115_vm4, %v2340_v21 }
 0x3b0   :  { %2348 = vmatprep.subr.msk.bf16.mxu1 %vm3115_vm4, %v2346_v22  ;;  %v2352_v28 = vpack.c.bf16 %v2544_v24, %v2543_v25  ;;  %v2358_v32 = vpack.c.bf16 %v2549_v30, %v2548_v31  ;;  %v742_v30 = vld [vmem:[%s3426_s7] sm:$0xff]  ;;  %v744_v31 = vld [vmem:[%s3426_s7 + $0x10] sm:$0xff] }
 0x3b7   :  { %2351 = vmatpush3.bf16.xpose.msk.msra.mxu1 %vm3115_vm4, %v2346_v22 }
 0x3b8   :  { %2354 = vmatprep.subr.msk.bf16.mxu1 %vm3115_vm4, %v2352_v28 }
 0x3bf   :  { %2357 = vmatpush3.bf16.xpose.msk.msra.mxu1 %vm3115_vm4, %v2352_v28 }
 0x3c0   :  { %2360 = vmatprep.subr.msk.bf16.mxu1 %vm3115_vm4, %v2358_v32 }
 0x3c7   :  { %2363 = vmatpush3.bf16.xpose.msk.msra.mxu1 %vm3115_vm4, %v2358_v32  ;;  %v745_v32 = vld [vmem:[%s3426_s7 + $0x18] sm:$0xff] }
 0x3ce   :  { %2131 = vmatmul.mubr.msk.f32.vlgmr.msra.gmra.mrb[2].mxu1 %vm238_vm3, %v3087_v0 }
 0x4a1   :  { %v2132_v35 = vpop.f32.mrb[2].mxu1 }
 0x4a2   :  { %v529_v36 = vadd.f32 %v2132_v35, %v3137_v33  ;;  %v523_v37 = vpop.f32.mrb[3].mxu1  ;;  %v2400_v35 = vpack.c.bf16 %v745_v32, %v744_v31  ;;  %v848_v31 = vld [vmem:[#allocation7 + $0x18] sm:$0xff] }
 0x4a3   :  { %v524_v46 = vadd.f32 %v523_v37, %v3139_v34 }
 0x4a4   :  { %v535_v47 = vsel %vm136_vm0, %v529_v36, -inf }
 0x4a5   :  { %536 = vmax.xlane.f32.xlu0 %v535_v47  ;;  %v532_v48 = vsel %vm136_vm0, %v524_v46, -inf }
 0x4a6   :  { %533 = vmax.xlane.f32.xlu1 %v532_v48 }
 0x4b7   :  { %381 = vrot.lane.b32.xlu1 %v3028_v39, %s2809_s2  ;;  %v234_v39 = vld [vmem:[%s3424_s5 + $0x30] sm:$0xff]  ;;  %s1887_s5 = sshll.u32 %s2810_s24, 4  ;;  %s1888_s5 = int_to_ptr.vmem [resolvable:$true] %s1887_s5 }
 0x4b8   :  { %v3187_v5 = vpack.c.bf16 %v235_v4, %v234_v39  ;;  %s2768_s26 = scalar_lea.vmem %s1888_s5, 256  ;;  %p2773_p13 = scmp.lt.s32.totalorder %s1888_s5, %s1888_s5 }
 0x4b9   :  { %p2769_p12 = scmp.ne.s32.totalorder %s1888_s5, %s2768_s26  ;;  %p2774_p0 = scmp.lt.s32.totalorder %s2768_s26, %s2768_s26 }
 0x4ba   :  { %2377 = vmatprep.subr.bf16.mxu0 %v3187_v5 }
 0x4bb   :  { %379 = vrot.lane.b32.xlu0 %v3022_v38, %s2809_s2  ;;  %383 = vrot.lane.b32.xlu1 %v3033_v40, %s2809_s2  ;;  %p2775_p1 = por %p2774_p0, %p2773_p13 }
 0x4bc   :  { %2379 = vmatpush3.bf16.msra.mxu0 %v3187_v5 }
 0x4bd   :  { %p2776_p2 = pnand %p2775_p1, %p2769_p12 }
 0x4bf   :  { %385 = vrot.lane.b32.xlu0 %v3045_v42, %s2809_s2  ;;  %387 = vrot.lane.b32.xlu1 %v3052_v43, %s2809_s2 }
 0x4c3   :  { %389 = vrot.lane.b32.xlu0 %v3058_v44, %s2809_s2  ;;  %391 = vrot.lane.b32.xlu1 %v3039_v41, %s2809_s2 }
 0x4c7   :  { %393 = vrot.lane.b32.xlu0 %v3064_v45, %s2809_s2 }
 0x532   :  { %v537_v38 = vpop.xlane.xlu0 %536 }
 0x533   :  { %v539_v40 = vsub.f32 %v529_v36, %v537_v38  ;;  %v534_v6 = vpop.xlane.xlu1 %533 }
 0x534   :  { %v538_v42 = vsub.f32 %v524_v46, %v534_v6 }
 0x535   :  { %v542_v7 = vmul.f32 1.442695, %v539_v40 }
 0x536   :  { %v540_v8 = vmul.f32 1.442695, %v538_v42  ;;  %v3201_v43 = vpop.permute.xlu0 %379 }
 0x537   :  { %v403_v9 = vmul.f32 %v3201_v43, %v3091_v2  ;;  %v3205_v10 = vpop.permute.xlu1 %381 }
 0x538   :  { %2614 = vpow2.f32 %v540_v8  ;;  %v404_v41 = vmul.f32 %v3087_v0, %v3205_v10 }
 0x539   :  { %2616 = vpow2.f32 %v542_v7 }
 0x53a   :  { %v2550_v44 = vpack.i.bf16 %v404_v41, %v403_v9  ;;  %v3209_v45 = vpop.permute.xlu0 %385 }
 0x53b   :  { %v406_v11 = vmul.f32 %v3087_v0, %v3209_v45  ;;  %v3213_v12 = vpop.permute.xlu1 %383 }
 0x53c   :  { %v405_v13 = vmul.f32 %v3213_v12, %v3091_v2  ;;  %2551 = vrot.lane.b32.xlu1 %v2550_v44, %s2809_s2 }
 0x53e   :  { %v2555_v14 = vpack.i.bf16 %v406_v11, %v405_v13  ;;  %v3218_v15 = vpop.permute.xlu0 %389 }
 0x53f   :  { %v408_v16 = vmul.f32 %v3087_v0, %v3218_v15  ;;  %v3222_v17 = vpop.permute.xlu1 %387 }
 0x540   :  { %v407_v18 = vmul.f32 %v3222_v17, %v3091_v2  ;;  %2556 = vrot.lane.b32.xlu0 %v2555_v14, %s2809_s2 }
 0x542   :  { %v2615_v19 = vpop.eup %2614  ;;  %v2560_v21 = vpack.i.bf16 %v408_v16, %v407_v18  ;;  %v3227_v22 = vpop.permute.xlu0 %393 }
 0x543   :  { %v2617_v23 = vpop.eup %2616  ;;  %v410_v24 = vmul.f32 %v3087_v0, %v3227_v22  ;;  %2149 = vmatprep.mubr.msk.f32.mxu0 %vm136_vm0, %v2615_v19  ;;  %v3232_v25 = vpop.permute.xlu1 %391  ;;  %v743_v0 = vld [vmem:[%s3426_s7 + $0x8] sm:$0xff] }
 0x544   :  { %v409_v28 = vmul.f32 %v3232_v25, %v3091_v2  ;;  %2150 = vmatmul.mubr.msk.f32.vlgmr.msra.gmra.mrb[2].mxu0 %vm136_vm0, %v2617_v23  ;;  %2561 = vrot.lane.b32.xlu1 %v2560_v21, %s2809_s2  ;;  %v2396_v2 = vpack.c.bf16 %v743_v0, %v742_v30  ;;  %v846_v30 = vld [vmem:[#allocation7 + $0x8] sm:$0xff] }
 0x546   :  { %v2565_v29 = vpack.i.bf16 %v410_v24, %v409_v28  ;;  %2397 = vmatprep.subr.bf16.mxu1 %v2396_v2 }
 0x547   :  { %2399 = vmatpush3.bf16.msra.mxu1 %v2396_v2 }
 0x548   :  { %2566 = vrot.lane.b32.xlu0 %v2565_v29, %s2809_s2  ;;  %2401 = vmatprep.subr.bf16.mxu1 %v2400_v35  ;;  %v845_v29 = vld [vmem:[#allocation7] sm:$0xff] }
 0x549   :  { %v2404_v0 = vpack.c.bf16 %v846_v30, %v845_v29 }
 0x54b   :  { %2403 = vmatpush3.bf16.msra.mxu1 %v2400_v35 }
 0x5ae   :  { %v2552_v36 = vpop.permute.xlu1 %2551 }
 0x5af   :  { %v2554_v37 = vunpack.i.h.bf16 %v2552_v36  ;;  %v2553_v46 = vunpack.i.l.bf16 %v2552_v36 }
 0x5b1   :  { %v2380_v47 = vpack.c.bf16 %v2554_v37, %v2553_v46 }
 0x5b2   :  { %v2557_v48 = vpop.permute.xlu0 %2556 }
 0x5b3   :  { %v2559_v49 = vunpack.i.h.bf16 %v2557_v48  ;;  %v2558_v50 = vunpack.i.l.bf16 %v2557_v48  ;;  %2381 = vmatprep.subr.bf16.mxu0 %v2380_v47 }
 0x5b4   :  { %2383 = vmatpush3.bf16.msra.mxu0 %v2380_v47 }
 0x5b5   :  { %v2384_v52 = vpack.c.bf16 %v2559_v49, %v2558_v50 }
 0x5b6   :  { %v2562_v53 = vpop.permute.xlu1 %2561 }
 0x5b7   :  { %v2564_v55 = vunpack.i.h.bf16 %v2562_v53  ;;  %v2563_v1 = vunpack.i.l.bf16 %v2562_v53  ;;  %2385 = vmatprep.subr.bf16.mxu0 %v2384_v52  ;;  %v953_v53 = vld [vmem:[#allocation8 + $0x8] sm:$0xff] }
 0x5b8   :  { %2387 = vmatpush3.bf16.msra.mxu0 %v2384_v52  ;;  %v952_v52 = vld [vmem:[#allocation8] sm:$0xff] }
 0x5b9   :  { %v2388_v39 = vpack.c.bf16 %v2564_v55, %v2563_v1  ;;  %v2412_v55 = vpack.c.bf16 %v953_v53, %v952_v52  ;;  %v954_v1 = vld [vmem:[#allocation8 + $0x10] sm:$0xff] }
 0x5ba   :  { %v2567_v4 = vpop.permute.xlu0 %2566 }
 0x5bb   :  { %v2569_v38 = vunpack.i.h.bf16 %v2567_v4  ;;  %v2568_v40 = vunpack.i.l.bf16 %v2567_v4  ;;  %2389 = vmatprep.subr.bf16.mxu0 %v2388_v39  ;;  %2413 = vmatprep.subr.bf16.mxu1 %v2412_v55 }
 0x5bc   :  { %2391 = vmatpush3.bf16.msra.mxu0 %v2388_v39  ;;  %v955_v39 = vld [vmem:[#allocation8 + $0x18] sm:$0xff] }
 0x5bd   :  { %v2392_v6 = vpack.c.bf16 %v2569_v38, %v2568_v40  ;;  %v2416_v4 = vpack.c.bf16 %v955_v39, %v954_v1 }
 0x5bf   :  { %2393 = vmatprep.subr.bf16.mxu0 %v2392_v6 }
 0x5c0   :  { %2395 = vmatpush3.bf16.msra.mxu0 %v2392_v6 }
 0x5c1   :  { %2405 = vmatprep.subr.bf16.mxu0 %v2404_v0 }
 0x617   :  { %v2151_v42 = vpop.f32.mrb[2].mxu0 }
 0x618   :  { %2618 = vrcp.f32 %v2151_v42  ;;  %v616_v7 = vpop.f32.mrb[3].mxu0 }
 0x619   :  { %2620 = vrcp.f32 %v616_v7 }
 0x622   :  { %v2619_v8 = vpop.eup %2618 }
 0x623   :  { %v2621_v9 = vpop.eup %2620  ;;  %v628_v44 = vmul.f32 %v2619_v8, %v2617_v23 }
 0x624   :  { %v627_v41 = vmul.f32 %v2621_v9, %v2615_v19 }
 0x626   :  { %2168 = vmatprep.mubr.msk.f32.mxu0 %vm136_vm0, %v627_v41 }
 0x627   :  { %2169 = vmatmul.mubr.msk.f32.vlgmr.msra.gmra.mrb[4].mxu0 %vm136_vm0, %v628_v44 }
 0x628   :  { %2407 = vmatpush3.bf16.msra.mxu0 %v2404_v0 }
 0x6fa   :  { %v2170_v11 = vpop.f32.mrb[4].mxu0 }
 0x6fb   :  { %v733_v13 = vpop.f32.mrb[5].mxu0 }
 0x6fc   :  { %2179 = vmatprep.mubr.msk.f32.mxu1 %vm238_vm3, %v733_v13 }
 0x6fd   :  { %2180 = vmatmul.mubr.msk.f32.vlgmr.msra.gmra.mrb[4].mxu1 %vm238_vm3, %v2170_v11 }
 0x6fe   :  { %2415 = vmatpush3.bf16.msra.mxu1 %v2412_v55 }
 0x6ff   :  { %2417 = vmatprep.subr.bf16.mxu1 %v2416_v4 }
 0x702   :  { %2419 = vmatpush3.bf16.msra.mxu1 %v2416_v4 }
 0x7d0   :  { %v2181_v14 = vpop.f32.mrb[4].mxu1 }
 0x7d1   :  { %v3256_v16 = vadd.f32 %v2181_v14, %v2997_v26  ;;  %v818_v18 = vpop.f32.mrb[5].mxu1  ;;  %v847_v26 = vld [vmem:[#allocation7 + $0x10] sm:$0xff] }
 0x7d2   :  { %v3259_v21 = vadd.f32 %v818_v18, %v2999_v27  ;;  %v2408_v2 = vpack.c.bf16 %v848_v31, %v847_v26 }
 0x7d3   :  { %v830_v19 = vmul.f32 %v3256_v16, %v3256_v16 }
 0x7d4   :  { %v829_v23 = vmul.f32 %v3259_v21, %v3259_v21  ;;  %2409 = vmatprep.subr.bf16.mxu0 %v2408_v2 }
 0x7d5   :  { %v834_v24 = vsel %vm238_vm3, %v830_v19, 0.0  ;;  %2411 = vmatpush3.bf16.msra.mxu0 %v2408_v2 }
 0x7d6   :  { %835 = vadd.xlane.f32.xlu0 %v834_v24  ;;  %v831_v28 = vsel %vm238_vm3, %v829_v23, 0.0 }
 0x7d7   :  { %832 = vadd.xlane.f32.xlu1 %v831_v28 }
 0x863   :  { %v836_v27 = vpop.xlane.xlu0 %835 }
 0x864   :  { %v838_v32 = vmul.f32 0.03125, %v836_v27  ;;  %v833_v35 = vpop.xlane.xlu1 %832 }
 0x865   :  { %v837_v36 = vmul.f32 0.03125, %v833_v35 }
 0x866   :  { %v840_v37 = vadd.f32 1e-08, %v838_v32 }
 0x867   :  { %v839_v46 = vadd.f32 1e-08, %v837_v36  ;;  %v1929_v36 = vld [vmem:[%s3425_s6 + $0x30] sm:$0xff] }
 0x868   :  { %2622 = vrsqrt.f32 %v840_v37 }
 0x869   :  { %2624 = vrsqrt.f32 %v839_v46  ;;  %v1930_v46 = vld [vmem:[%s3425_s6 + $0x38] sm:$0xff] }
 0x872   :  { %v2623_v47 = vpop.eup %2622 }
 0x873   :  { %v2625_v48 = vpop.eup %2624  ;;  %v844_v50 = vmul.f32 %v2623_v47, %v3256_v16  ;;  %v2424_v47 = vpack.c.bf16 %v1930_v46, %v1929_v36 }
 0x874   :  { %v843_v49 = vmul.f32 %v2625_v48, %v3259_v21 }
 0x876   :  { %2190 = vmatprep.mubr.msk.f32.mxu0 %vm238_vm3, %v843_v49 }
 0x877   :  { %2191 = vmatmul.mubr.msk.f32.vlgmr.msra.gmra.mrb[6].mxu0 %vm238_vm3, %v844_v50 }
 0x94a   :  { %v2192_v38 = vpop.f32.mrb[6].mxu0 }
 0x94b   :  { %946 = vrot.lane.b32.xlu1 %v2192_v38, %s2808_s4  ;;  %v921_v40 = vpop.f32.mrb[7].mxu0  ;;  %v931_v42 = vsub.f32 0.0, %v2192_v38 }
 0x94c   :  { %944 = vrot.lane.b32.xlu0 %v921_v40, %s2808_s4  ;;  %v930_v6 = vsub.f32 0.0, %v921_v40 }
 0x94d   :  { %v934_v8 = vmul.f32 1.442695, %v931_v42 }
 0x94e   :  { %v932_v7 = vmul.f32 1.442695, %v930_v6 }
 0x950   :  { %2626 = vpow2.f32 %v932_v7 }
 0x951   :  { %2628 = vpow2.f32 %v934_v8 }
 0x95a   :  { %v2627_v9 = vpop.eup %2626 }
 0x95b   :  { %v2629_v41 = vpop.eup %2628  ;;  %v936_v44 = vadd.f32 1.0, %v2627_v9 }
 0x95c   :  { %v937_v11 = vadd.f32 1.0, %v2629_v41 }
 0x95d   :  { %2630 = vrcp.f32 %v936_v44 }
 0x95e   :  { %2632 = vrcp.f32 %v937_v11 }
 0x967   :  { %v2631_v13 = vpop.eup %2630 }
 0x968   :  { %v2633_v14 = vpop.eup %2632  ;;  %v940_v19 = vmul.f32 %v2631_v13, %v921_v40 }
 0x969   :  { %v941_v23 = vmul.f32 %v2633_v14, %v2192_v38 }
 0x9bd   :  { %v947_v18 = vpop.permute.xlu1 %946 }
 0x9be   :  { %v945_v24 = vpop.permute.xlu0 %944  ;;  %v951_v29 = vmul.f32 %v947_v18, %v941_v23 }
 0x9bf   :  { %v950_v28 = vmul.f32 %v945_v24, %v940_v19 }
 0x9c1   :  { %2201 = vmatprep.mubr.msk.f32.mxu1 %vm238_vm3, %v950_v28 }
 0x9c2   :  { %2202 = vmatmul.mubr.msk.f32.vlgmr.msra.gmra.mrb[6].mxu1 %vm238_vm3, %v951_v29 }
 0xa95   :  { %v2203_v30 = vpop.f32.mrb[6].mxu1 }
 0xa96   :  { %v3276_v26 = vadd.f32 %v2203_v30, %v3256_v16  ;;  %v1028_v0 = vpop.f32.mrb[7].mxu1  ;;  %v1927_v16 = vld [vmem:[%s3425_s6 + $0x20] sm:$0xff] }
 0xa97   :  { %v3279_v31 = vadd.f32 %v1028_v0, %v3259_v21  ;;  %v1928_v21 = vld [vmem:[%s3425_s6 + $0x28] sm:$0xff] }
 0xa98   :  { %v1040_v2 = vmul.f32 %v3276_v26, %v3276_v26  ;;  %v2420_v37 = vpack.c.bf16 %v1928_v21, %v1927_v16 }
 0xa99   :  { %v1039_v27 = vmul.f32 %v3279_v31, %v3279_v31 }
 0xa9a   :  { %v1044_v32 = vsel %vm238_vm3, %v1040_v2, 0.0  ;;  %2421 = vmatprep.subr.bf16.mxu0 %v2420_v37 }
 0xa9b   :  { %1045 = vadd.xlane.f32.xlu0 %v1044_v32  ;;  %v1041_v35 = vsel %vm238_vm3, %v1039_v27, 0.0  ;;  %2423 = vmatpush3.bf16.msra.mxu0 %v2420_v37 }
 0xa9c   :  { %1042 = vadd.xlane.f32.xlu1 %v1041_v35  ;;  %2425 = vmatprep.subr.bf16.mxu0 %v2424_v47 }
 0xa9f   :  { %2427 = vmatpush3.bf16.msra.mxu0 %v2424_v47 }
 0xaa0   :  { %2453 = vmatprep.subr.bf16.mxu0 %v3151_v51 }
 0xb28   :  { %v1046_v48 = vpop.xlane.xlu0 %1045 }
 0xb29   :  { %v1048_v49 = vmul.f32 0.03125, %v1046_v48  ;;  %v1043_v50 = vpop.xlane.xlu1 %1042 }
 0xb2a   :  { %v1047_v52 = vmul.f32 0.03125, %v1043_v50 }
 0xb2b   :  { %v1050_v53 = vadd.f32 1e-08, %v1048_v49 }
 0xb2c   :  { %v1049_v55 = vadd.f32 1e-08, %v1047_v52 }
 0xb2d   :  { %2634 = vrsqrt.f32 %v1050_v53 }
 0xb2e   :  { %2636 = vrsqrt.f32 %v1049_v55 }
 0xb37   :  { %v2635_v1 = vpop.eup %2634 }
 0xb38   :  { %v2637_v39 = vpop.eup %2636  ;;  %v1054_v38 = vmul.f32 %v2635_v1, %v3276_v26 }
 0xb39   :  { %v1053_v4 = vmul.f32 %v2637_v39, %v3279_v31 }
 0xb3b   :  { %2212 = vmatprep.mubr.msk.f32.mxu0 %vm238_vm3, %v1053_v4 }
 0xb3c   :  { %2213 = vmatmul.mubr.msk.f32.vlgmr.msra.gmra.mrb[8].mxu0 %vm238_vm3, %v1054_v38 }
 0xb3d   :  { %2455 = vmatpush3.bf16.msra.mxu0 %v3151_v51 }
 0xb3e   :  { %2457 = vmatprep.subr.bf16.mxu0 %v3161_v54 }
 0xb41   :  { %2459 = vmatpush3.bf16.msra.mxu0 %v3161_v54 }
 0xb42   :  { %2461 = vmatprep.subr.bf16.mxu0 %v3173_v3 }
 0xb45   :  { %2463 = vmatpush3.bf16.msra.mxu0 %v3173_v3 }
 0xb46   :  { %2465 = vmatprep.subr.bf16.mxu0 %v3187_v5 }
 0xb49   :  { %2467 = vmatpush3.bf16.msra.mxu0 %v3187_v5 }
 0xc0f   :  { %v2214_v40 = vpop.f32.mrb[8].mxu0 }
 0xc10   :  { %v1132_v6 = vpop.f32.mrb[9].mxu0  ;;  %v1144_v42 = vmul.f32 %v2214_v40, %v3075_v58  ;;  %v1142_v7 = vmul.f32 %v2214_v40, %v3081_v61  ;;  %v1146_v51 = vmul.f32 %v2214_v40, %v3079_v60  ;;  %v1148_v8 = vmul.f32 %v2214_v40, %v3083_v62 }
 0xc11   :  { %2231 = vmatprep.mubr.msk.f32.mxu1 %vm238_vm3, %v1132_v6  ;;  %v1143_v54 = vmul.f32 %v1132_v6, %v3073_v57  ;;  %v1141_v3 = vmul.f32 %v1132_v6, %v3071_v56  ;;  %v1145_v9 = vmul.f32 %v1132_v6, %v3077_v59  ;;  %v1147_v5 = vmul.f32 %v1132_v6, %v3085_v63 }
 0xc12   :  { %v1151_v41 = vmul.f32 %v1132_v6, %v3213_v12  ;;  %v1152_v58 = vmul.f32 %v2214_v40, %v3209_v45  ;;  %v1149_v61 = vmul.f32 %v1132_v6, %v3201_v43  ;;  %v1150_v60 = vmul.f32 %v2214_v40, %v3205_v10 }
 0xc13   :  { %v2575_v44 = vpack.i.bf16 %v1144_v42, %v1143_v54  ;;  %v2570_v62 = vpack.i.bf16 %v1142_v7, %v1141_v3  ;;  %v2580_v11 = vpack.i.bf16 %v1146_v51, %v1145_v9  ;;  %v2585_v13 = vpack.i.bf16 %v1148_v8, %v1147_v5 }
 0xc14   :  { %v2595_v14 = vpack.i.bf16 %v1152_v58, %v1151_v41  ;;  %v2590_v57 = vpack.i.bf16 %v1150_v60, %v1149_v61  ;;  %v1153_v56 = vmul.f32 %v1132_v6, %v3222_v17  ;;  %v1154_v59 = vmul.f32 %v2214_v40, %v3218_v15  ;;  %v1947_v41 = vld [vmem:[%s3426_s7 + $0x20] sm:$0xff]  ;;  %v1948_v58 = vld [vmem:[%s3426_s7 + $0x28] sm:$0xff]  ;;  %v1949_v61 = vld [vmem:[%s3426_s7 + $0x30] sm:$0xff] }
 0xc15   :  { %2576 = vrot.lane.b32.xlu1 %v2575_v44, %s2808_s4  ;;  %2571 = vrot.lane.b32.xlu0 %v2570_v62, %s2808_s4  ;;  %v1155_v63 = vmul.f32 %v1132_v6, %v3232_v25  ;;  %v1156_v43 = vmul.f32 %v2214_v40, %v3227_v22  ;;  %v2484_v60 = vpack.c.bf16 %v1948_v58, %v1947_v41  ;;  %v1950_v44 = vld [vmem:[%s3426_s7 + $0x38] sm:$0xff]  ;;  %v1790_v58 = vld [vmem:[#allocation10 + $0x10] sm:$0xff] }
 0xc16   :  { %v2600_v45 = vpack.i.bf16 %v1154_v59, %v1153_v56  ;;  %v2488_v62 = vpack.c.bf16 %v1950_v44, %v1949_v61  ;;  %v1791_v61 = vld [vmem:[#allocation10 + $0x18] sm:$0xff] }
 0xc17   :  { %v2605_v10 = vpack.i.bf16 %v1156_v43, %v1155_v63 }
 0xc19   :  { %2581 = vrot.lane.b32.xlu1 %v2580_v11, %s2808_s4  ;;  %2586 = vrot.lane.b32.xlu0 %v2585_v13, %s2808_s4 }
 0xc87   :  { %v2577_v12 = vpop.permute.xlu1 %2576  ;;  %v2572_v18 = vpop.permute.xlu0 %2571 }
 0xc88   :  { %v2579_v19 = vunpack.i.h.bf16 %v2577_v12  ;;  %v2578_v17 = vunpack.i.l.bf16 %v2577_v12  ;;  %v2574_v23 = vunpack.i.h.bf16 %v2572_v18  ;;  %v2573_v15 = vunpack.i.l.bf16 %v2572_v18 }
 0xc8a   :  { %v2428_v24 = vpack.c.bf16 %v2574_v23, %v2573_v15  ;;  %v2434_v28 = vpack.c.bf16 %v2579_v19, %v2578_v17 }
 0xc8b   :  { %v2582_v25 = vpop.permute.xlu1 %2581  ;;  %v2587_v0 = vpop.permute.xlu0 %2586 }
 0xc8c   :  { %2430 = vmatprep.subr.msk.bf16.mxu1 %vm3115_vm4, %v2428_v24  ;;  %v2584_v22 = vunpack.i.h.bf16 %v2582_v25  ;;  %v2583_v29 = vunpack.i.l.bf16 %v2582_v25  ;;  %v2589_v2 = vunpack.i.h.bf16 %v2587_v0  ;;  %v2588_v27 = vunpack.i.l.bf16 %v2587_v0 }
 0xc8d   :  { %2433 = vmatpush3.bf16.xpose.msk.msra.mxu1 %vm3115_vm4, %v2428_v24  ;;  %v1593_v24 = vld [vmem:[#allocation7 + $0x20] sm:$0xff] }
 0xc8e   :  { %2436 = vmatprep.subr.msk.bf16.mxu1 %vm3115_vm4, %v2434_v28  ;;  %v2440_v30 = vpack.c.bf16 %v2584_v22, %v2583_v29  ;;  %v2446_v32 = vpack.c.bf16 %v2589_v2, %v2588_v27  ;;  %v1596_v22 = vld [vmem:[#allocation7 + $0x38] sm:$0xff] }
 0xc95   :  { %2439 = vmatpush3.bf16.xpose.msk.msra.mxu1 %vm3115_vm4, %v2434_v28  ;;  %v1594_v28 = vld [vmem:[#allocation7 + $0x28] sm:$0xff] }
 0xc96   :  { %2442 = vmatprep.subr.msk.bf16.mxu1 %vm3115_vm4, %v2440_v30  ;;  %v2492_v25 = vpack.c.bf16 %v1594_v28, %v1593_v24 }
 0xc9d   :  { %2445 = vmatpush3.bf16.xpose.msk.msra.mxu1 %vm3115_vm4, %v2440_v30 }
 0xc9e   :  { %2448 = vmatprep.subr.msk.bf16.mxu1 %vm3115_vm4, %v2446_v32 }
 0xca5   :  { %2451 = vmatpush3.bf16.xpose.msk.msra.mxu1 %vm3115_vm4, %v2446_v32 }
 0xca6   :  { %2485 = vmatprep.subr.bf16.mxu1 %v2484_v60 }
 0xcac   :  { %2232 = vmatmul.mubr.msk.f32.vlgmr.msra.gmra.mrb[8].mxu1 %vm238_vm3, %v2214_v40 }
 0xcad   :  { %2487 = vmatpush3.bf16.msra.mxu1 %v2484_v60  ;;  %v2512_v60 = vpack.c.bf16 %v1791_v61, %v1790_v58 }
 0xcae   :  { %2489 = vmatprep.subr.bf16.mxu1 %v2488_v62 }
 0xcb1   :  { %2491 = vmatpush3.bf16.msra.mxu1 %v2488_v62 }
 0xd7f   :  { %v2233_v35 = vpop.f32.mrb[8].mxu1 }
 0xd80   :  { %v1275_v16 = vadd.f32 %v2233_v35, %v3137_v33  ;;  %v1269_v21 = vpop.f32.mrb[9].mxu1 }
 0xd81   :  { %v1270_v36 = vadd.f32 %v1269_v21, %v3139_v34 }
 0xd82   :  { %v1281_v37 = vsel %vm136_vm0, %v1275_v16, -inf }
 0xd83   :  { %1282 = vmax.xlane.f32.xlu0 %v1281_v37  ;;  %v1278_v46 = vsel %vm136_vm0, %v1270_v36, -inf  ;;  %v1701_v37 = vld [vmem:[#allocation8 + $0x20] sm:$0xff] }
 0xd84   :  { %1279 = vmax.xlane.f32.xlu1 %v1278_v46  ;;  %v1702_v46 = vld [vmem:[#allocation8 + $0x28] sm:$0xff] }
 0xd95   :  { %2596 = vrot.lane.b32.xlu1 %v2595_v14, %s2809_s2 }
 0xd99   :  { %2591 = vrot.lane.b32.xlu0 %v2590_v57, %s2809_s2  ;;  %2601 = vrot.lane.b32.xlu1 %v2600_v45, %s2809_s2 }
 0xd9d   :  { %2606 = vrot.lane.b32.xlu0 %v2605_v10, %s2809_s2 }
 0xe10   :  { %v1283_v20 = vpop.xlane.xlu0 %1282 }
 0xe11   :  { %v1285_v47 = vsub.f32 %v1275_v16, %v1283_v20  ;;  %v1280_v33 = vpop.xlane.xlu1 %1279  ;;  %v2500_v20 = vpack.c.bf16 %v1702_v46, %v1701_v37 }
 0xe12   :  { %v1284_v48 = vsub.f32 %v1270_v36, %v1280_v33  ;;  %v1704_v33 = vld [vmem:[#allocation8 + $0x38] sm:$0xff] }
 0xe13   :  { %v1288_v49 = vmul.f32 1.442695, %v1285_v47  ;;  %2501 = vmatprep.subr.bf16.mxu1 %v2500_v20  ;;  %v1703_v47 = vld [vmem:[#allocation8 + $0x30] sm:$0xff] }
 0xe14   :  { %v1286_v34 = vmul.f32 1.442695, %v1284_v48  ;;  %v2592_v50 = vpop.permute.xlu0 %2591  ;;  %v2504_v48 = vpack.c.bf16 %v1704_v33, %v1703_v47 }
 0xe15   :  { %v2594_v52 = vunpack.i.h.bf16 %v2592_v50  ;;  %v2593_v53 = vunpack.i.l.bf16 %v2592_v50  ;;  %v2597_v1 = vpop.permute.xlu1 %2596 }
 0xe16   :  { %2638 = vpow2.f32 %v1286_v34  ;;  %v2599_v39 = vunpack.i.h.bf16 %v2597_v1  ;;  %v2598_v4 = vunpack.i.l.bf16 %v2597_v1  ;;  %v1789_v34 = vld [vmem:[#allocation10 + $0x8] sm:$0xff] }
 0xe17   :  { %2640 = vpow2.f32 %v1288_v49  ;;  %v2468_v55 = vpack.c.bf16 %v2594_v52, %v2593_v53  ;;  %v1788_v49 = vld [vmem:[#allocation10] sm:$0xff] }
 0xe18   :  { %v2472_v42 = vpack.c.bf16 %v2599_v39, %v2598_v4  ;;  %v2607_v8 = vpop.permute.xlu0 %2606  ;;  %v2508_v50 = vpack.c.bf16 %v1789_v34, %v1788_v49 }
 0xe19   :  { %2469 = vmatprep.subr.bf16.mxu0 %v2468_v55  ;;  %v2602_v38 = vpop.permute.xlu1 %2601  ;;  %v2609_v54 = vunpack.i.h.bf16 %v2607_v8  ;;  %v2608_v3 = vunpack.i.l.bf16 %v2607_v8 }
 0xe1a   :  { %v2604_v7 = vunpack.i.h.bf16 %v2602_v38  ;;  %v2603_v51 = vunpack.i.l.bf16 %v2602_v38 }
 0xe1b   :  { %v2480_v5 = vpack.c.bf16 %v2609_v54, %v2608_v3 }
 0xe1c   :  { %v2476_v9 = vpack.c.bf16 %v2604_v7, %v2603_v51 }
 0xe20   :  { %v2639_v40 = vpop.eup %2638 }
 0xe21   :  { %v2641_v6 = vpop.eup %2640  ;;  %2250 = vmatprep.mubr.msk.f32.mxu0 %vm136_vm0, %v2639_v40 }
 0xe22   :  { %2251 = vmatmul.mubr.msk.f32.vlgmr.msra.gmra.mrb[10].mxu0 %vm136_vm0, %v2641_v6 }
 0xe23   :  { %2471 = vmatpush3.bf16.msra.mxu0 %v2468_v55 }
 0xe24   :  { %2473 = vmatprep.subr.bf16.mxu0 %v2472_v42 }
 0xe27   :  { %2475 = vmatpush3.bf16.msra.mxu0 %v2472_v42 }
 0xe28   :  { %2477 = vmatprep.subr.bf16.mxu0 %v2476_v9 }
 0xe2b   :  { %2479 = vmatpush3.bf16.msra.mxu0 %v2476_v9 }
 0xe2c   :  { %2481 = vmatprep.subr.bf16.mxu0 %v2480_v5 }
 0xe2f   :  { %2483 = vmatpush3.bf16.msra.mxu0 %v2480_v5 }
 0xe30   :  { %2493 = vmatprep.subr.bf16.mxu0 %v2492_v25 }
 0xef5   :  { %v2252_v11 = vpop.f32.mrb[10].mxu0 }
 0xef6   :  { %2642 = vrcp.f32 %v2252_v11  ;;  %v1362_v13 = vpop.f32.mrb[11].mxu0 }
 0xef7   :  { %2644 = vrcp.f32 %v1362_v13 }
 0xf00   :  { %v2643_v14 = vpop.eup %2642 }
 0xf01   :  { %v2645_v57 = vpop.eup %2644  ;;  %v1374_v59 = vmul.f32 %v2643_v14, %v2641_v6  ;;  %v1957_v14 = vld [vmem:[%s3430_s11] ss:$0 sm:$0xff] }
 0xf02   :  { %v1373_v56 = vmul.f32 %v2645_v57, %v2639_v40 }
 0xf04   :  { %2269 = vmatprep.mubr.msk.f32.mxu0 %vm136_vm0, %v1373_v56 }
 0xf05   :  { %2270 = vmatmul.mubr.msk.f32.vlgmr.msra.gmra.mrb[12].mxu0 %vm136_vm0, %v1374_v59 }
 0xf06   :  { %2495 = vmatpush3.bf16.msra.mxu0 %v2492_v25 }
 0xfd8   :  { %v2271_v63 = vpop.f32.mrb[12].mxu0 }
 0xfd9   :  { %v1479_v43 = vpop.f32.mrb[13].mxu0 }
 0xfda   :  { %2280 = vmatprep.mubr.msk.f32.mxu1 %vm238_vm3, %v1479_v43 }
 0xfdb   :  { %2281 = vmatmul.mubr.msk.f32.vlgmr.msra.gmra.mrb[10].mxu1 %vm238_vm3, %v2271_v63 }
 0xfdc   :  { %2503 = vmatpush3.bf16.msra.mxu1 %v2500_v20 }
 0xfdd   :  { %2505 = vmatprep.subr.bf16.mxu1 %v2504_v48 }
 0xfe0   :  { %2507 = vmatpush3.bf16.msra.mxu1 %v2504_v48 }
0x10ae   :  { %v2282_v45 = vpop.f32.mrb[10].mxu1 }
0x10af   :  { %v3376_v10 = vadd.f32 %v2282_v45, %v3276_v26  ;;  %v1565_v12 = vpop.f32.mrb[11].mxu1  ;;  %v1595_v26 = vld [vmem:[#allocation7 + $0x30] sm:$0xff] }
0x10b0   :  { %v3379_v18 = vadd.f32 %v1565_v12, %v3279_v31  ;;  %v2496_v29 = vpack.c.bf16 %v1596_v22, %v1595_v26 }
0x10b1   :  { %v1577_v19 = vmul.f32 %v3376_v10, %v3376_v10 }
0x10b2   :  { %v1576_v17 = vmul.f32 %v3379_v18, %v3379_v18  ;;  %2497 = vmatprep.subr.bf16.mxu0 %v2496_v29 }
0x10b3   :  { %v1581_v23 = vsel %vm238_vm3, %v1577_v19, 0.0  ;;  %2499 = vmatpush3.bf16.msra.mxu0 %v2496_v29 }
0x10b4   :  { %1582 = vadd.xlane.f32.xlu0 %v1581_v23  ;;  %v1578_v15 = vsel %vm238_vm3, %v1576_v17, 0.0  ;;  %2509 = vmatprep.subr.bf16.mxu0 %v2508_v50 }
0x10b5   :  { %1579 = vadd.xlane.f32.xlu1 %v1578_v15 }
0x1141   :  { %v1583_v31 = vpop.xlane.xlu0 %1582 }
0x1142   :  { %v1585_v30 = vmul.f32 0.03125, %v1583_v31  ;;  %v1580_v0 = vpop.xlane.xlu1 %1579 }
0x1143   :  { %v1584_v2 = vmul.f32 0.03125, %v1580_v0 }
0x1144   :  { %v1587_v27 = vadd.f32 1e-08, %v1585_v30 }
0x1145   :  { %v1586_v32 = vadd.f32 1e-08, %v1584_v2 }
0x1146   :  { %2646 = vrsqrt.f32 %v1587_v27 }
0x1147   :  { %2648 = vrsqrt.f32 %v1586_v32 }
0x1150   :  { %v2647_v35 = vpop.eup %2646 }
0x1151   :  { %v2649_v16 = vpop.eup %2648  ;;  %v1591_v36 = vmul.f32 %v2647_v35, %v3376_v10 }
0x1152   :  { %v1590_v21 = vmul.f32 %v2649_v16, %v3379_v18 }
0x1154   :  { %2291 = vmatprep.mubr.msk.f32.mxu0 %vm238_vm3, %v1590_v21 }
0x1155   :  { %2292 = vmatmul.mubr.msk.f32.vlgmr.msra.gmra.mrb[14].mxu0 %vm238_vm3, %v1591_v36 }
0x1156   :  { %2511 = vmatpush3.bf16.msra.mxu0 %v2508_v50 }
0x1157   :  { %2513 = vmatprep.subr.bf16.mxu0 %v2512_v60 }
0x115a   :  { %2515 = vmatpush3.bf16.msra.mxu0 %v2512_v60 }
0x1228   :  { %v2293_v52 = vpop.f32.mrb[14].mxu0 }
0x1229   :  { %1694 = vrot.lane.b32.xlu1 %v2293_v52, %s2808_s4  ;;  %v1669_v53 = vpop.f32.mrb[15].mxu0  ;;  %v1679_v1 = vsub.f32 0.0, %v2293_v52 }
0x122a   :  { %1692 = vrot.lane.b32.xlu0 %v1669_v53, %s2808_s4  ;;  %v1678_v55 = vsub.f32 0.0, %v1669_v53 }
0x122b   :  { %v1682_v4 = vmul.f32 1.442695, %v1679_v1 }
0x122c   :  { %v1680_v39 = vmul.f32 1.442695, %v1678_v55 }
0x122e   :  { %2650 = vpow2.f32 %v1680_v39 }
0x122f   :  { %2652 = vpow2.f32 %v1682_v4 }
0x1238   :  { %v2651_v38 = vpop.eup %2650 }
0x1239   :  { %v2653_v40 = vpop.eup %2652  ;;  %v1684_v6 = vadd.f32 1.0, %v2651_v38 }
0x123a   :  { %v1685_v42 = vadd.f32 1.0, %v2653_v40 }
0x123b   :  { %2654 = vrcp.f32 %v1684_v6 }
0x123c   :  { %2656 = vrcp.f32 %v1685_v42 }
0x1245   :  { %v2655_v7 = vpop.eup %2654 }
0x1246   :  { %v2657_v51 = vpop.eup %2656  ;;  %v1688_v54 = vmul.f32 %v2655_v7, %v1669_v53 }
0x1247   :  { %v1689_v3 = vmul.f32 %v2657_v51, %v2293_v52 }
0x129b   :  { %v1695_v8 = vpop.permute.xlu1 %1694 }
0x129c   :  { %v1693_v9 = vpop.permute.xlu0 %1692  ;;  %v1699_v41 = vmul.f32 %v1695_v8, %v1689_v3 }
0x129d   :  { %v1698_v5 = vmul.f32 %v1693_v9, %v1688_v54 }
0x129f   :  { %2302 = vmatprep.mubr.msk.f32.mxu1 %vm238_vm3, %v1698_v5 }
0x12a0   :  { %2303 = vmatmul.mubr.msk.f32.vlgmr.msra.gmra.mrb[12].mxu1 %vm238_vm3, %v1699_v41 }
0x1373   :  { %v2304_v44 = vpop.f32.mrb[12].mxu1 }
0x1374   :  { %v1777_v62 = vpop.f32.mrb[13].mxu1  ;;  %v1787_v13 = vadd.f32 %v2304_v44, %v3376_v10 }
0x1375   :  { %v1786_v11 = vadd.f32 %v1777_v62, %v3379_v18 }
0x1377   :  { %2313 = vmatprep.mubr.msk.f32.mxu0 %vm238_vm3, %v1786_v11 }
0x1378   :  { %2314 = vmatmul.mubr.msk.f32.vlgmr.msra.gmra.mrb[16].mxu0 %vm238_vm3, %v1787_v13 }
0x144b   :  { %v2315_v57 = vpop.f32.mrb[16].mxu0 }
0x144c   :  { %v1877_v56 = vadd.f32 %v2315_v57, %v1957_v14  ;;  %v1871_v59 = vpop.f32.mrb[17].mxu0 }
0x144d   :  { %v1872_v63 = vadd.f32 %v1957_v14, %v1871_v59 }
0x144e   :  { %1881 = vst.msk [vmem:[#allocation11 + $0x8] sm:$0xff] %vm136_vm0, %v1877_v56 }
0x144f   :  { %1880 = vst.msk [vmem:[#allocation11] sm:$0xff] %vm136_vm0, %v1872_v63 }
0x1450   :  { %2779 = shalt.err (!%p2776_p2)
}
0x1451   :  { %s2780_s0 = scalar_lea.hbm %s3431_s12, 256 }
0x1452   :  { %p2781_p3 = scmp.ne.s32.totalorder %s3431_s12, %s2780_s0  ;;  %p2784_p4 = scmp.lt.u32.totalorder %s2780_s0, %s3431_s12 }
0x1454   :  { %p2786_p5 = pnand %p2784_p4, %p2781_p3 }
0x1456   :  { %2789 = shalt.err (!%p2786_p5)
}
0x1457   :  { %1893 = dma.vmem_to_hbm [thread:$0]  %s1888_s5, 256, %s3431_s12, [#allocation4], %s2800_s15, %s2800_s15, %s2801_s16  }
0x1458   :  { %2796 = dma.done.wait [#allocation4], 256  }
0x1459   :  { %2797 = vsyncadd [#allocation4], 4294967040 }
0x145a   :  { %1897 = vsyncpa [#allocation3], 1 }
0x145b   :  { %1898 = vsyncpa [#allocation6], 1 }
0x145c   :  { %1899 = vsyncpa [#allocation9], 1 }
0x145d   :  { %1900 = vsyncpa [#allocation4], 1 }

</bundles_post_ra>
